<compile_context>
chip_gen: v5e
topology: v5e:2x2
jax: 0.10.0
libtpu: 0.0.40
codegen_flags: <defaults>
</compile_context>

<pallas_src>
import jax
import jax.numpy as jnp
from jax import lax
from jax.experimental import pallas as pl
from jax.experimental.pallas import tpu as pltpu

_LANE = 128     # lane width: channel dims padded to multiples of this
_WPAD_L = 8     # left zero-pad columns in the VMEM scratch (sublane aligned)


def _round_up(v, m):
    return (v + m - 1) // m * m


def _make_block_kernel(H, W, Cin, Cin_p, Cout_p, Hout, Wout, stride):
    """Fused depthwise3x3+BN+ReLU -> pointwise1x1+BN+ReLU kernel (one image)."""
    Hp = H + 2              # 1 zero row of halo top + bottom
    Wq = W + _WPAD_L + 8    # 8 zero cols left (tile aligned) + >=2 zero cols right

    def kernel(x_ref, dww_ref, b1_ref, pww_ref, b2_ref, o_ref, xpad_ref):
        # x_ref    : (1, H, W, Cin)        activation block (true channel count)
        # dww_ref  : (9, Cin_p)    f32     depthwise taps, BN1 scale folded in
        # b1_ref   : (1, Cin_p)    f32     BN1 folded bias
        # pww_ref  : (Cin_p, Cout_p) bf16  pointwise weights, BN2 scale folded in
        # b2_ref   : (1, Cout_p)   f32     BN2 folded bias
        # o_ref    : (1, Hout, Wout, Cout_p)
        # xpad_ref : (Hp, Wq, Cin_p) f32   VMEM scratch (spatial halo + lane pad)

        # Build the zero-padded image in VMEM.  The full zero-fill also clears
        # the lane-padding channels (stale VMEM could hold Inf/NaN and
        # 0 * NaN = NaN would otherwise leak into the GEMM via padded K lanes).
        xpad_ref[...] = jnp.zeros_like(xpad_ref)
        xpad_ref[1:H + 1, _WPAD_L:_WPAD_L + W, 0:Cin] = (
            x_ref[0].astype(jnp.float32))

        # --- depthwise 3x3: 9 strided ref-level taps, acc seeded by tap 0 ---
        dw = dww_ref[...]                                   # (9, Cin_p), hoisted
        acc = None
        for kh in range(3):
            for kw in range(3):
                if stride == 1:
                    rows = pl.ds(kh, Hout)
                    cols = pl.ds(kw + _WPAD_L - 1, Wout)
                else:
                    rows = pl.ds(kh, Hout, stride)
                    cols = pl.ds(kw + _WPAD_L - 1, Wout, stride)
                patch = xpad_ref[rows, cols, :]             # (Hout, Wout, Cin_p)
                term = patch * dw[3 * kh + kw].reshape(1, 1, Cin_p)
                acc = term if acc is None else acc + term

        # --- BN1 bias + ReLU (scale already folded into the taps) ---
        h1 = jnp.maximum(acc + b1_ref[...].reshape(1, 1, Cin_p), 0.0)

        # --- pointwise 1x1 conv: one MXU matmul, bf16 operands, f32 acc ---
        h2 = jnp.dot(h1.reshape(Hout * Wout, Cin_p).astype(jnp.bfloat16),
                     pww_ref[...],
                     preferred_element_type=jnp.float32)    # (Hout*Wout, Cout_p)

        # --- BN2 bias + ReLU ---
        h2 = jnp.maximum(h2 + b2_ref[...], 0.0)
        o_ref[0] = h2.reshape(Hout, Wout, Cout_p).astype(o_ref.dtype)

    return kernel, Hp, Wq


def block_forward(x_nchw, params, stride=1, eps=1e-5):
    """Pallas forward. x_nchw: (N, Cin, H, W) f32 -> (N, Cout, Hout, Wout) f32."""
    w_dw = params["w_dw"]                      # (Cin, 1, 3, 3)   PyTorch layout
    g1, b1, m1, v1 = params["bn1"]             # (Cin,) each
    w_pw = params["w_pw"]                      # (Cout, Cin, 1, 1)
    g2, b2, m2, v2 = params["bn2"]             # (Cout,) each

    N, Cin, H, W = x_nchw.shape
    Cout = w_pw.shape[0]
    Hout = (H + 2 - 3) // stride + 1
    Wout = (W + 2 - 3) // stride + 1
    Cin_p = _round_up(Cin, _LANE)
    Cout_p = _round_up(Cout, _LANE)

    # NCHW -> NHWC (channels last = lane axis).  No host-side spatial/channel
    # padding of the activations: that is done in VMEM inside the kernel.
    x_nhwc = jnp.transpose(x_nchw, (0, 2, 3, 1))            # (N, H, W, Cin)

    # Fold eval-mode BatchNorm: scale into the conv weights, shift into a bias.
    inv1 = g1 / jnp.sqrt(v1 + eps)                          # (Cin,)
    inv2 = g2 / jnp.sqrt(v2 + eps)                          # (Cout,)

    dww = jnp.transpose(w_dw[:, 0], (1, 2, 0)) * inv1[None, None, :]   # (3,3,Cin)
    dww = jnp.pad(dww.reshape(9, Cin), ((0, 0), (0, Cin_p - Cin)))      # (9,Cin_p)
    bb1 = jnp.pad(b1 - m1 * inv1, (0, Cin_p - Cin)).reshape(1, Cin_p)

    pww = jnp.transpose(w_pw[:, :, 0, 0], (1, 0)) * inv2[None, :]       # (Cin,Cout)
    pww = jnp.pad(pww, ((0, Cin_p - Cin), (0, Cout_p - Cout)))
    pww = pww.astype(jnp.bfloat16)                                      # MXU operand
    bb2 = jnp.pad(b2 - m2 * inv2, (0, Cout_p - Cout)).reshape(1, Cout_p)

    kernel, Hp, Wq = _make_block_kernel(H, W, Cin, Cin_p, Cout_p,
                                        Hout, Wout, stride)

    out_p = pl.pallas_call(
        kernel,
        out_shape=jax.ShapeDtypeStruct((N, Hout, Wout, Cout_p), jnp.float32),
        grid_spec=pltpu.PrefetchScalarGridSpec(
            num_scalar_prefetch=0,
            grid=(N,),                                      # one image per step
            in_specs=[
                pl.BlockSpec((1, H, W, Cin), lambda n: (n, 0, 0, 0)),
                pl.BlockSpec((9, Cin_p), lambda n: (0, 0)),
                pl.BlockSpec((1, Cin_p), lambda n: (0, 0)),
                pl.BlockSpec((Cin_p, Cout_p), lambda n: (0, 0)),
                pl.BlockSpec((1, Cout_p), lambda n: (0, 0)),
            ],
            out_specs=pl.BlockSpec((1, Hout, Wout, Cout_p),
                                   lambda n: (n, 0, 0, 0)),
            scratch_shapes=[pltpu.VMEM((Hp, Wq, Cin_p), jnp.float32)],
        ),
        compiler_params=pltpu.CompilerParams(
            dimension_semantics=("parallel",),              # batch is independent
            vmem_limit_bytes=32 * 1024 * 1024,              # explicit, with headroom
        ),
    )(x_nhwc, dww, bb1, pww, bb2)

    out = out_p[..., :Cout]                                 # drop lane padding
    return jnp.transpose(out, (0, 3, 1, 2))                 # back to NCHW


def block_reference(x, params, stride=1, eps=1e-5):
    """Plain-JAX (XLA conv) reference, NCHW, eval-mode BN."""
    w_dw = params["w_dw"]; g1, b1, m1, v1 = params["bn1"]
    w_pw = params["w_pw"]; g2, b2, m2, v2 = params["bn2"]
    Cin = x.shape[1]

    def bn(y, g, b, m, v):
        inv = g / jnp.sqrt(v + eps)
        return y * inv[None, :, None, None] + (b - m * inv)[None, :, None, None]

    y = lax.conv_general_dilated(x, w_dw, (stride, stride), ((1, 1), (1, 1)),
                                 feature_group_count=Cin,
                                 dimension_numbers=("NCHW", "OIHW", "NCHW"))
    y = jnp.maximum(bn(y, g1, b1, m1, v1), 0.0)
    y = lax.conv_general_dilated(y, w_pw, (1, 1), ((0, 0), (0, 0)),
                                 dimension_numbers=("NCHW", "OIHW", "NCHW"))
    y = jnp.maximum(bn(y, g2, b2, m2, v2), 0.0)
    return y


def init_params(key, in_planes, out_planes):
    k = jax.random.split(key, 8)
    params = {
        "w_dw": 0.2 * jax.random.normal(k[0], (in_planes, 1, 3, 3), jnp.float32),
        "bn1": (1.0 + 0.1 * jax.random.normal(k[1], (in_planes,), jnp.float32),   # gamma
                0.1 * jax.random.normal(k[2], (in_planes,), jnp.float32),         # beta
                0.1 * jax.random.normal(k[3], (in_planes,), jnp.float32),         # running_mean
                0.5 + jax.random.uniform(k[4], (in_planes,), jnp.float32)),       # running_var
        "w_pw": 0.2 * jax.random.normal(k[5], (out_planes, in_planes, 1, 1), jnp.float32),
        "bn2": (1.0 + 0.1 * jax.random.normal(k[6], (out_planes,), jnp.float32),
                0.1 * jax.random.normal(k[7], (out_planes,), jnp.float32),
                jnp.zeros((out_planes,), jnp.float32),
                jnp.ones((out_planes,), jnp.float32)),
    }
    return params


if __name__ == "__main__":
    key = jax.random.PRNGKey(0)
    kx, kp = jax.random.split(key)

    N, Cin, Cout, H, W = 2, 4, 8, 16, 16
    x = jax.random.normal(kx, (N, Cin, H, W), jnp.float32)
    params = init_params(kp, Cin, Cout)

    for stride in (1, 2):
        out = jax.block_until_ready(block_forward(x, params, stride=stride))
        ref = jax.block_until_ready(block_reference(x, params, stride=stride))
        assert out.shape == ref.shape, (stride, out.shape, ref.shape)
        max_err = float(jnp.max(jnp.abs(out - ref)))
        # bf16 MXU operands for the 1x1 conv -> tolerance looser than pure f32.
        assert max_err < 5e-2, f"stride={stride} max abs error {max_err}"

    print("KERNEL_OK")
</pallas_src>

<mosaic_0001>
module attributes {stable_mosaic.version = 11 : i64} {
  func.func @kernel(%arg0: i32, %arg1: memref<1x16x16x4xf32, #tpu.memory_space<vmem>>, %arg2: memref<9x128xf32, #tpu.memory_space<vmem>>, %arg3: memref<1x128xf32, #tpu.memory_space<vmem>>, %arg4: memref<128x128xbf16, #tpu.memory_space<vmem>>, %arg5: memref<1x128xf32, #tpu.memory_space<vmem>>, %arg6: memref<1x16x16x128xf32, #tpu.memory_space<vmem>>, %arg7: memref<18x32x128xf32, #tpu.memory_space<vmem>>) attributes {dimension_semantics = [#tpu.dimension_semantics<parallel>], iteration_bounds = array<i64: 2>, scalar_prefetch = 0 : i64, scratch_operands = 1 : i64, tpu.core_type = #tpu.core_type<tc>, window_params = [{transform_indices = @transform_0, window_bounds = array<i64: 1, 16, 16, 4>}, {pipeline_mode = #tpu.pipeline_mode<synchronous>, transform_indices = @transform_1, window_bounds = array<i64: 9, 128>}, {pipeline_mode = #tpu.pipeline_mode<synchronous>, transform_indices = @transform_2, window_bounds = array<i64: 1, 128>}, {pipeline_mode = #tpu.pipeline_mode<synchronous>, transform_indices = @transform_3, window_bounds = array<i64: 128, 128>}, {pipeline_mode = #tpu.pipeline_mode<synchronous>, transform_indices = @transform_4, window_bounds = array<i64: 1, 128>}, {transform_indices = @transform_5, window_bounds = array<i64: 1, 16, 16, 128>}]} {
    %cst = arith.constant 0.000000e+00 : f32
    %0 = vector.broadcast %cst : f32 to vector<18x32x128xf32>
    %c0 = arith.constant 0 : index
    %c0_0 = arith.constant 0 : index
    %c0_1 = arith.constant 0 : index
    %1 = vector.load %arg7[%c0, %c0_0, %c0_1] : memref<18x32x128xf32, #tpu.memory_space<vmem>>, vector<18x32x128xf32>
    tpu.vector_store %arg7[%c0, %c0_0, %c0_1], %0 {strides = array<i32>} : memref<18x32x128xf32, #tpu.memory_space<vmem>>, vector<18x32x128xf32>,
    %c0_2 = arith.constant 0 : index
    %c0_3 = arith.constant 0 : index
    %c0_4 = arith.constant 0 : index
    %c0_5 = arith.constant 0 : index
    %2 = vector.load %arg1[%c0_2, %c0_3, %c0_4, %c0_5] : memref<1x16x16x4xf32, #tpu.memory_space<vmem>>, vector<1x16x16x4xf32>
    %3 = vector.shape_cast %2 : vector<1x16x16x4xf32> to vector<16x16x4xf32>
    %c1 = arith.constant 1 : index
    %c8 = arith.constant 8 : index
    %c0_6 = arith.constant 0 : index
    %4 = vector.load %arg7[%c1, %c8, %c0_6] : memref<18x32x128xf32, #tpu.memory_space<vmem>>, vector<16x16x4xf32>
    tpu.vector_store %arg7[%c1, %c8, %c0_6], %3 {strides = array<i32>} : memref<18x32x128xf32, #tpu.memory_space<vmem>>, vector<16x16x4xf32>,
    %c0_7 = arith.constant 0 : index
    %c0_8 = arith.constant 0 : index
    %5 = vector.load %arg2[%c0_7, %c0_8] : memref<9x128xf32, #tpu.memory_space<vmem>>, vector<9x128xf32>
    %c0_9 = arith.constant 0 : index
    %c7 = arith.constant 7 : index
    %c0_10 = arith.constant 0 : index
    %6 = vector.load %arg7[%c0_9, %c7, %c0_10] : memref<18x32x128xf32, #tpu.memory_space<vmem>>, vector<16x16x128xf32>
    %7 = vector.extract_strided_slice %5 {offsets = [0, 0], sizes = [1, 128], strides = [1, 1]} : vector<9x128xf32> to vector<1x128xf32>
    %8 = vector.shape_cast %7 : vector<1x128xf32> to vector<128xf32>
    %9 = vector.shape_cast %8 : vector<128xf32> to vector<1x1x128xf32>
    %10 = vector.broadcast %9 : vector<1x1x128xf32> to vector<16x16x128xf32>
    %11 = arith.mulf %6, %10 : vector<16x16x128xf32>
    %c0_11 = arith.constant 0 : index
    %c8_12 = arith.constant 8 : index
    %c0_13 = arith.constant 0 : index
    %12 = vector.load %arg7[%c0_11, %c8_12, %c0_13] : memref<18x32x128xf32, #tpu.memory_space<vmem>>, vector<16x16x128xf32>
    %13 = vector.extract_strided_slice %5 {offsets = [1, 0], sizes = [1, 128], strides = [1, 1]} : vector<9x128xf32> to vector<1x128xf32>
    %14 = vector.shape_cast %13 : vector<1x128xf32> to vector<128xf32>
    %15 = vector.shape_cast %14 : vector<128xf32> to vector<1x1x128xf32>
    %16 = vector.broadcast %15 : vector<1x1x128xf32> to vector<16x16x128xf32>
    %17 = arith.mulf %12, %16 : vector<16x16x128xf32>
    %18 = arith.addf %11, %17 : vector<16x16x128xf32>
    %c0_14 = arith.constant 0 : index
    %c9 = arith.constant 9 : index
    %c0_15 = arith.constant 0 : index
    %19 = vector.load %arg7[%c0_14, %c9, %c0_15] : memref<18x32x128xf32, #tpu.memory_space<vmem>>, vector<16x16x128xf32>
    %20 = vector.extract_strided_slice %5 {offsets = [2, 0], sizes = [1, 128], strides = [1, 1]} : vector<9x128xf32> to vector<1x128xf32>
    %21 = vector.shape_cast %20 : vector<1x128xf32> to vector<128xf32>
    %22 = vector.shape_cast %21 : vector<128xf32> to vector<1x1x128xf32>
    %23 = vector.broadcast %22 : vector<1x1x128xf32> to vector<16x16x128xf32>
    %24 = arith.mulf %19, %23 : vector<16x16x128xf32>
    %25 = arith.addf %18, %24 : vector<16x16x128xf32>
    %c1_16 = arith.constant 1 : index
    %c7_17 = arith.constant 7 : index
    %c0_18 = arith.constant 0 : index
    %26 = vector.load %arg7[%c1_16, %c7_17, %c0_18] : memref<18x32x128xf32, #tpu.memory_space<vmem>>, vector<16x16x128xf32>
    %27 = vector.extract_strided_slice %5 {offsets = [3, 0], sizes = [1, 128], strides = [1, 1]} : vector<9x128xf32> to vector<1x128xf32>
    %28 = vector.shape_cast %27 : vector<1x128xf32> to vector<128xf32>
    %29 = vector.shape_cast %28 : vector<128xf32> to vector<1x1x128xf32>
    %30 = vector.broadcast %29 : vector<1x1x128xf32> to vector<16x16x128xf32>
    %31 = arith.mulf %26, %30 : vector<16x16x128xf32>
    %32 = arith.addf %25, %31 : vector<16x16x128xf32>
    %c1_19 = arith.constant 1 : index
    %c8_20 = arith.constant 8 : index
    %c0_21 = arith.constant 0 : index
    %33 = vector.load %arg7[%c1_19, %c8_20, %c0_21] : memref<18x32x128xf32, #tpu.memory_space<vmem>>, vector<16x16x128xf32>
    %34 = vector.extract_strided_slice %5 {offsets = [4, 0], sizes = [1, 128], strides = [1, 1]} : vector<9x128xf32> to vector<1x128xf32>
    %35 = vector.shape_cast %34 : vector<1x128xf32> to vector<128xf32>
    %36 = vector.shape_cast %35 : vector<128xf32> to vector<1x1x128xf32>
    %37 = vector.broadcast %36 : vector<1x1x128xf32> to vector<16x16x128xf32>
    %38 = arith.mulf %33, %37 : vector<16x16x128xf32>
    %39 = arith.addf %32, %38 : vector<16x16x128xf32>
    %c1_22 = arith.constant 1 : index
    %c9_23 = arith.constant 9 : index
    %c0_24 = arith.constant 0 : index
    %40 = vector.load %arg7[%c1_22, %c9_23, %c0_24] : memref<18x32x128xf32, #tpu.memory_space<vmem>>, vector<16x16x128xf32>
    %41 = vector.extract_strided_slice %5 {offsets = [5, 0], sizes = [1, 128], strides = [1, 1]} : vector<9x128xf32> to vector<1x128xf32>
    %42 = vector.shape_cast %41 : vector<1x128xf32> to vector<128xf32>
    %43 = vector.shape_cast %42 : vector<128xf32> to vector<1x1x128xf32>
    %44 = vector.broadcast %43 : vector<1x1x128xf32> to vector<16x16x128xf32>
    %45 = arith.mulf %40, %44 : vector<16x16x128xf32>
    %46 = arith.addf %39, %45 : vector<16x16x128xf32>
    %c2 = arith.constant 2 : index
    %c7_25 = arith.constant 7 : index
    %c0_26 = arith.constant 0 : index
    %47 = vector.load %arg7[%c2, %c7_25, %c0_26] : memref<18x32x128xf32, #tpu.memory_space<vmem>>, vector<16x16x128xf32>
    %48 = vector.extract_strided_slice %5 {offsets = [6, 0], sizes = [1, 128], strides = [1, 1]} : vector<9x128xf32> to vector<1x128xf32>
    %49 = vector.shape_cast %48 : vector<1x128xf32> to vector<128xf32>
    %50 = vector.shape_cast %49 : vector<128xf32> to vector<1x1x128xf32>
    %51 = vector.broadcast %50 : vector<1x1x128xf32> to vector<16x16x128xf32>
    %52 = arith.mulf %47, %51 : vector<16x16x128xf32>
    %53 = arith.addf %46, %52 : vector<16x16x128xf32>
    %c2_27 = arith.constant 2 : index
    %c8_28 = arith.constant 8 : index
    %c0_29 = arith.constant 0 : index
    %54 = vector.load %arg7[%c2_27, %c8_28, %c0_29] : memref<18x32x128xf32, #tpu.memory_space<vmem>>, vector<16x16x128xf32>
    %55 = vector.extract_strided_slice %5 {offsets = [7, 0], sizes = [1, 128], strides = [1, 1]} : vector<9x128xf32> to vector<1x128xf32>
    %56 = vector.shape_cast %55 : vector<1x128xf32> to vector<128xf32>
    %57 = vector.shape_cast %56 : vector<128xf32> to vector<1x1x128xf32>
    %58 = vector.broadcast %57 : vector<1x1x128xf32> to vector<16x16x128xf32>
    %59 = arith.mulf %54, %58 : vector<16x16x128xf32>
    %60 = arith.addf %53, %59 : vector<16x16x128xf32>
    %c2_30 = arith.constant 2 : index
    %c9_31 = arith.constant 9 : index
    %c0_32 = arith.constant 0 : index
    %61 = vector.load %arg7[%c2_30, %c9_31, %c0_32] : memref<18x32x128xf32, #tpu.memory_space<vmem>>, vector<16x16x128xf32>
    %62 = vector.extract_strided_slice %5 {offsets = [8, 0], sizes = [1, 128], strides = [1, 1]} : vector<9x128xf32> to vector<1x128xf32>
    %63 = vector.shape_cast %62 : vector<1x128xf32> to vector<128xf32>
    %64 = vector.shape_cast %63 : vector<128xf32> to vector<1x1x128xf32>
    %65 = vector.broadcast %64 : vector<1x1x128xf32> to vector<16x16x128xf32>
    %66 = arith.mulf %61, %65 : vector<16x16x128xf32>
    %67 = arith.addf %60, %66 : vector<16x16x128xf32>
    %c0_33 = arith.constant 0 : index
    %c0_34 = arith.constant 0 : index
    %68 = vector.load %arg3[%c0_33, %c0_34] : memref<1x128xf32, #tpu.memory_space<vmem>>, vector<1x128xf32>
    %69 = vector.shape_cast %68 : vector<1x128xf32> to vector<1x1x128xf32>
    %70 = vector.broadcast %69 : vector<1x1x128xf32> to vector<16x16x128xf32>
    %71 = arith.addf %67, %70 : vector<16x16x128xf32>
    %cst_35 = arith.constant 0.000000e+00 : f32
    %72 = vector.broadcast %cst_35 : f32 to vector<16x16x128xf32>
    %73 = arith.maximumf %71, %72 : vector<16x16x128xf32>
    %74 = vector.shape_cast %73 : vector<16x16x128xf32> to vector<256x128xf32>
    %75 = arith.truncf %74 : vector<256x128xf32> to vector<256x128xbf16>
    %c0_36 = arith.constant 0 : index
    %c0_37 = arith.constant 0 : index
    %76 = vector.load %arg4[%c0_36, %c0_37] : memref<128x128xbf16, #tpu.memory_space<vmem>>, vector<128x128xbf16>
    %cst_38 = arith.constant dense<0.000000e+00> : vector<256x128xf32>
    %77 = tpu.matmul %75, %76, %cst_38 {dimension_numbers = #tpu.dot_dimension_numbers<[1], [0], [0], [1], [0, 0, 1, 1], [], []>} : vector<256x128xbf16>, vector<128x128xbf16>, vector<256x128xf32> -> vector<256x128xf32>
    %c0_39 = arith.constant 0 : index
    %c0_40 = arith.constant 0 : index
    %78 = vector.load %arg5[%c0_39, %c0_40] : memref<1x128xf32, #tpu.memory_space<vmem>>, vector<1x128xf32>
    %79 = vector.broadcast %78 : vector<1x128xf32> to vector<256x128xf32>
    %80 = arith.addf %77, %79 : vector<256x128xf32>
    %cst_41 = arith.constant 0.000000e+00 : f32
    %81 = vector.broadcast %cst_41 : f32 to vector<256x128xf32>
    %82 = arith.maximumf %80, %81 : vector<256x128xf32>
    %83 = vector.shape_cast %82 : vector<256x128xf32> to vector<16x16x128xf32>
    %c0_42 = arith.constant 0 : index
    %c0_43 = arith.constant 0 : index
    %c0_44 = arith.constant 0 : index
    %c0_45 = arith.constant 0 : index
    %84 = vector.load %arg6[%c0_42, %c0_43, %c0_44, %c0_45] : memref<1x16x16x128xf32, #tpu.memory_space<vmem>>, vector<1x16x16x128xf32>
    %85 = vector.shape_cast %84 : vector<1x16x16x128xf32> to vector<16x16x128xf32>
    %86 = vector.shape_cast %83 : vector<16x16x128xf32> to vector<1x16x16x128xf32>
    tpu.vector_store %arg6[%c0_42, %c0_43, %c0_44, %c0_45], %86 {strides = array<i32>} : memref<1x16x16x128xf32, #tpu.memory_space<vmem>>, vector<1x16x16x128xf32>,
    return
  }
  func.func @transform_0(%arg0: i32) -> (i32, i32, i32, i32) {
    %c0_i32 = arith.constant 0 : i32
    %c0_i32_0 = arith.constant 0 : i32
    %c0_i32_1 = arith.constant 0 : i32
    %c0_i32_2 = arith.constant 0 : i32
    return %arg0, %c0_i32, %c0_i32_0, %c0_i32_1 : i32, i32, i32, i32
  }
  func.func @transform_1(%arg0: i32) -> (i32, i32) {
    %c0_i32 = arith.constant 0 : i32
    %c0_i32_0 = arith.constant 0 : i32
    %c0_i32_1 = arith.constant 0 : i32
    return %c0_i32, %c0_i32_0 : i32, i32
  }
  func.func @transform_2(%arg0: i32) -> (i32, i32) {
    %c0_i32 = arith.constant 0 : i32
    %c0_i32_0 = arith.constant 0 : i32
    %c0_i32_1 = arith.constant 0 : i32
    return %c0_i32, %c0_i32_0 : i32, i32
  }
  func.func @transform_3(%arg0: i32) -> (i32, i32) {
    %c0_i32 = arith.constant 0 : i32
    %c0_i32_0 = arith.constant 0 : i32
    %c0_i32_1 = arith.constant 0 : i32
    return %c0_i32, %c0_i32_0 : i32, i32
  }
  func.func @transform_4(%arg0: i32) -> (i32, i32) {
    %c0_i32 = arith.constant 0 : i32
    %c0_i32_0 = arith.constant 0 : i32
    %c0_i32_1 = arith.constant 0 : i32
    return %c0_i32, %c0_i32_0 : i32, i32
  }
  func.func @transform_5(%arg0: i32) -> (i32, i32, i32, i32) {
    %c0_i32 = arith.constant 0 : i32
    %c0_i32_0 = arith.constant 0 : i32
    %c0_i32_1 = arith.constant 0 : i32
    %c0_i32_2 = arith.constant 0 : i32
    return %arg0, %c0_i32, %c0_i32_0, %c0_i32_1 : i32, i32, i32, i32
  }
}

</mosaic_0001>

<bundles_post_ra>
// kernel: tpu_custom_call.1
= control target key start
LH: loop header
LB: loop body
LE: loop exit
PB: predicated region body
PF: predicated region fallthrough
CT: control target
= control target key end

     0   :  { %10 = vsyncpa [#allocation4], 0  ;;  %s2948_s0 = inlined_call_operand.vmem [shape: f32[2,16,16,4], index: 0, kind: input, shape index: {}]   ;;  %s2949_s1 = inlined_call_operand.vmem [shape: f32[9,128], index: 1, kind: input, shape index: {}]   ;;  %s2950_s2 = inlined_call_operand.vmem [shape: f32[1,128], index: 2, kind: input, shape index: {}]   ;;  %s2951_s3 = inlined_call_operand.vmem [shape: bf16[128,128], index: 3, kind: input, shape index: {}]   ;;  %s2952_s4 = inlined_call_operand.vmem [shape: f32[1,128], index: 4, kind: input, shape index: {}]   ;;  %s2953_s5 = inlined_call_operand.hbm [shape: f32[2,16,16,128], index: 5, kind: output, shape index: {}]  }
   0x1   :  { %12 = vsyncpa [#allocation4 + $0x1], 0  ;;  %s1811_s18 = smov 0   ;;  %s1813_s19 = smov 0  }
   0x2   :  { %s1815_s20 = smov 0   ;;  %s1817_s21 = smov 0  }
   0x3 LB: > { %s1832_s22 = sadd.s32 4294967295, %s1776_s21   ;;  %s1588_s23 = sadd.s32 4294967294, %s1776_s21   ;;  %s1776_s21 = sphi %s1817_s21, %s3148_s21   ;;  %s1772_s20 = sphi %s1815_s20, %s3147_s20   ;;  %s1768_s19 = sphi %s1813_s19, %s3146_s19   ;;  %s1764_s18 = sphi %s1811_s18, %s3145_s18  }
   0x4   : > { %s1836_s24 = sadd.s32 1, %s1776_s21   ;;  %s135_s25 = sadd.s32 1, %s1772_s20 }
   0x5   : > { %s132_s26 = ssub.s32 %s1776_s21, %s1836_s24  ;;  %p145_p0 = scmp.ne.s32.totalorder %s1772_s20, %s1768_s19 }
   0x6   : > { %p133_p1 = scmp.eq.s32.totalorder %s132_s26, 0  ;;  %p146_p2 = scmp.eq.s32.totalorder %s1832_s22, 1 }
   0x7   : > { %p151_p3 = scmp.ne.s32.totalorder %s1768_s19, %s1764_s18  ;;  %p152_p4 = scmp.eq.s32.totalorder %s1588_s23, 1 }
   0x8   : > { %s1847_s27 = scalar_select %p133_p1, %s1772_s20, %s135_s25  }
   0x9   : > { %p1849_p5 = por %p146_p2, %p145_p0  ;;  %p1853_p6 = por %p152_p4, %p151_p3 }
   0xa   : > { %p1591_p7 = scmp.ge.s32.totalorder %s1776_s21, 1  ;;  %p190_p8 = scmp.lt.s32.totalorder %s1776_s21, 3 }
   0xc   : > { %p191_p9 = pnand %p1591_p7, %p190_p8 }
   0xe   : > { %194 = sbr.rel (%p191_p9) target bundleno = 430 (0x1ae), region = 40 }
  0x13   : > { %v1640_v0 = vld [vmem:[%s2951_s3 + $0x38] sm:$0xff]  ;;  %p218_p10 = scmp.lt.s32.totalorder %s1832_s22, 1  ;;  %v1778_v1 = vmov 0.0   ;;  %v1639_v2 = vld [vmem:[%s2951_s3 + $0x30] sm:$0xff]  ;;  %v1874_v3 = vld [vmem:[%s2949_s1] sm:$0xff]  ;;  %vm328_vm0 = vcmask 31744  }
  0x14   : > { %223 = vst [vmem:[#allocation2] sm:$0xff] %v1778_v1  ;;  %1357 = vmatpush.bf16.msra.mxu0 %v1640_v0  ;;  %1642 = vmatpush.bf16.msra.mxu1 %v1640_v0  ;;  %v1638_v4 = vld [vmem:[%s2951_s3 + $0x28] sm:$0xff]  ;;  %v1883_v5 = vperm.slane %v1874_v3, 0  ;;  %v1886_v6 = vperm.slane %v1874_v3, 1  ;;  %v1637_v8 = vld [vmem:[%s2951_s3 + $0x20] sm:$0xff]  ;;  %v1905_v14 = vperm.slane %v1874_v3, 2 }
  0x15   : > { %s219_s9 = scalar_select %p218_p10, %s1832_s22, 1  ;;  %224 = vst [vmem:[#allocation2 + $0x8] sm:$0xff] %v1778_v1  ;;  %1643 = vmatpush.bf16.msra.mxu2 %v1640_v0  ;;  %1644 = vmatpush.bf16.msra.mxu3 %v1640_v0  ;;  %v1636_v20 = vld [vmem:[%s2951_s3 + $0x18] sm:$0xff]  ;;  %v1921_v25 = vperm.slane %v1874_v3, 3  ;;  %v1924_v26 = vperm.slane %v1874_v3, 4  ;;  %v1635_v27 = vld [vmem:[%s2951_s3 + $0x10] sm:$0xff] }
  0x16   : > { %225 = vst [vmem:[#allocation2 + $0x10] sm:$0xff] %v1778_v1  ;;  %v461_v13 = vmul.f32 0.0, %v1886_v6  ;;  %v1932_v29 = vperm.slane %v1874_v3, 5  ;;  %v1951_v38 = vperm.slane %v1874_v3, 6  ;;  %v1634_v39 = vld [vmem:[%s2951_s3 + $0x8] sm:$0xff]  ;;  %v1971_v47 = vperm.slane %v1874_v3, 7 }
  0x17   : > { %226 = vst [vmem:[#allocation2 + $0x18] sm:$0xff] %v1778_v1  ;;  %s1632_s14 = sshll.u32 %s219_s9, 8  ;;  %v1986_v54 = vld [vmem:[%s2949_s1 + $0x8] ss:$0 sm:$0xff]  ;;  %v1633_v55 = vld [vmem:[%s2951_s3] sm:$0xff]  ;;  %s215_s26 = sand.u32 1, %s1768_s19  }
  0x18   : > { %227 = vst [vmem:[#allocation2 + $0x20] sm:$0xff] %v1778_v1  ;;  %1358 = vmatpush.bf16.msra.mxu0 %v1639_v2  ;;  %1645 = vmatpush.bf16.msra.mxu1 %v1639_v2  ;;  %s1892_s17 = scalar_lea.vmem %s2948_s0, %s1632_s14  ;;  %s1592_s7 = sshll.u32 %s215_s26, 8 }
  0x19   : > { %228 = vst [vmem:[#allocation2 + $0x28] sm:$0xff] %v1778_v1  ;;  %1646 = vmatpush.bf16.msra.mxu2 %v1639_v2  ;;  %1647 = vmatpush.bf16.msra.mxu3 %v1639_v2  ;;  %v295_v9 = vld [vmem:[%s1892_s17] sm:$0xff]  ;;  %v296_v11 = vld [vmem:[%s1892_s17 + $0x8] sm:$0xff]  ;;  %v297_v15 = vld [vmem:[%s1892_s17 + $0x10] sm:$0xff]  ;;  %s2848_s8 = scalar_lea.vmem [#allocation3], %s1592_s7  ;;  %s1641_s9 = sshll.u32 %s1832_s22, 8 }
  0x1a   : > { %229 = vst [vmem:[#allocation2 + $0x30] sm:$0xff] %v1778_v1  ;;  %v298_v18 = vld [vmem:[%s1892_s17 + $0x18] sm:$0xff]  ;;  %s1522_s12 = scalar_lea.hbm %s2953_s5, %s1641_s9  ;;  %s1523_s13 = sshll.u32 %s2848_s8, 4  ;;  %s1524_s13 = int_to_ptr.vmem [resolvable:$true] %s1523_s13 }
  0x1b   : > { %230 = vst [vmem:[#allocation2 + $0x38] sm:$0xff] %v1778_v1  ;;  %s1525_s14 = sshll.u32 %s1522_s12, 4  ;;  %s1511_s22 = scalar_lea.sflag [#allocation4], %s215_s26  ;;  %s1526_s14 = int_to_ptr.hbm [resolvable:$true] %s1525_s14 }
  0x1c   : > { %231 = vst [vmem:[#allocation2 + $0x40] sm:$0xff] %v1778_v1  ;;  %v363_v7 = vld [vmem:[#allocation2 + $0x7] sm:$0xff]  ;;  %1359 = vmatpush.bf16.msra.mxu0 %v1638_v4  ;;  %1648 = vmatpush.bf16.msra.mxu1 %v1638_v4  ;;  %s1728_s15 = sshra.s32 %s1526_s14, 4  ;;  %s1734_s25 = scalar_lea.hbm %s2953_s5, 512  ;;  %s1729_s15 = int_to_ptr.hbm [resolvable:$true] %s1728_s15 }
  0x1d   : > { %232 = vst [vmem:[#allocation2 + $0x48] sm:$0xff] %v1778_v1  ;;  %v364_v10 = vld [vmem:[#allocation2 + $0xf] sm:$0xff]  ;;  %1649 = vmatpush.bf16.msra.mxu2 %v1638_v4  ;;  %1650 = vmatpush.bf16.msra.mxu3 %v1638_v4  ;;  %v396_v12 = vmul.f32 %v1883_v5, %v363_v7  ;;  %s1730_s16 = scalar_lea.hbm %s1729_s15, 256  ;;  %p1735_p0 = scmp.lt.s32.totalorder %s1729_s15, %s2953_s5 }
  0x1e   : > { %233 = vst [vmem:[#allocation2 + $0x50] sm:$0xff] %v1778_v1  ;;  %v397_v16 = vmul.f32 %v1883_v5, %v364_v10  ;;  %v525_v17 = vld [vmem:[#allocation2 + $0x9] sm:$0xff]  ;;  %v526_v19 = vld [vmem:[#allocation2 + $0x11] sm:$0xff]  ;;  %p1731_p11 = scmp.ne.s32.totalorder %s1729_s15, %s1730_s16  ;;  %p1736_p1 = scmp.lt.s32.totalorder %s1734_s25, %s1730_s16 }
  0x1f   : > { %234 = vst [vmem:[#allocation2 + $0x58] sm:$0xff] %v1778_v1  ;;  %v493_v21 = vadd.f32 %v461_v13, %v396_v12  ;;  %v558_v22 = vmul.f32 %v1905_v14, %v525_v17  ;;  %v559_v24 = vmul.f32 %v1905_v14, %v526_v19  ;;  %v302_v19 = vld [vmem:[%s1892_s17 + $0x38] sm:$0xff] }
  0x20   : > { %329 = vst.msk [vmem:[#allocation2 + $0x28] sm:$0xff] %vm328_vm0, %v295_v9  ;;  %1360 = vmatpush.bf16.msra.mxu0 %v1637_v8  ;;  %1651 = vmatpush.bf16.msra.mxu1 %v1637_v8  ;;  %v494_v23 = vadd.f32 %v461_v13, %v397_v16  ;;  %p1732_p12 = pnand %p1731_p11, %p1849_p5  ;;  %p1737_p2 = por %p1736_p1, %p1735_p0 }
  0x21   : > { %330 = vst.msk [vmem:[#allocation2 + $0x30] sm:$0xff] %vm328_vm0, %v296_v11  ;;  %1652 = vmatpush.bf16.msra.mxu2 %v1637_v8  ;;  %1653 = vmatpush.bf16.msra.mxu3 %v1637_v8  ;;  %v590_v28 = vadd.f32 %v558_v22, %v493_v21  ;;  %v2014_v8 = vld [vmem:[%s2950_s2] ss:$0 sm:$0xff]  ;;  %v304_v21 = vld [vmem:[%s1892_s17 + $0x48] sm:$0xff]  ;;  %v305_v22 = vld [vmem:[%s1892_s17 + $0x50] sm:$0xff] }
  0x22   : > { %331 = vst.msk [vmem:[#allocation2 + $0x48] sm:$0xff] %vm328_vm0, %v297_v15  ;;  %v591_v30 = vadd.f32 %v559_v24, %v494_v23  ;;  %v306_v23 = vld [vmem:[%s1892_s17 + $0x58] sm:$0xff]  ;;  %v309_v24 = vld [vmem:[%s1892_s17 + $0x70] sm:$0xff]  ;;  %p1733_p13 = pneg %p1732_p12 }
  0x23   : > { %332 = vst.msk [vmem:[#allocation2 + $0x50] sm:$0xff] %vm328_vm0, %v298_v18  ;;  %v301_v18 = vld [vmem:[%s1892_s17 + $0x30] sm:$0xff] }
  0x24   : > { %235 = vst [vmem:[#allocation2 + $0x60] sm:$0xff] %v1778_v1  ;;  %1361 = vmatpush.bf16.msra.mxu0 %v1636_v20  ;;  %1654 = vmatpush.bf16.msra.mxu1 %v1636_v20  ;;  %p1738_p3 = pnand %p1737_p2, %p1733_p13 }
  0x25   : > { %236 = vst [vmem:[#allocation2 + $0x68] sm:$0xff] %v1778_v1  ;;  %1655 = vmatpush.bf16.msra.mxu2 %v1636_v20  ;;  %1656 = vmatpush.bf16.msra.mxu3 %v1636_v20  ;;  %v303_v20 = vld [vmem:[%s1892_s17 + $0x40] sm:$0xff] }
  0x26   : > { %237 = vst [vmem:[#allocation2 + $0x70] sm:$0xff] %v1778_v1 }
  0x27   : > { %v1935_v31 = vld [vmem:[#allocation2 + $0x27] sm:$0xff]  ;;  %238 = vst [vmem:[#allocation2 + $0x78] sm:$0xff] %v1778_v1 }
  0x28   : > { %v1937_v32 = vld [vmem:[#allocation2 + $0x28] sm:$0xff]  ;;  %v655_v34 = vmul.f32 %v1921_v25, %v1935_v31  ;;  %v1944_v35 = vld [vmem:[#allocation2 + $0x30] sm:$0xff]  ;;  %239 = vst [vmem:[#allocation2 + $0x80] sm:$0xff] %v1778_v1  ;;  %1362 = vmatpush.bf16.msra.mxu0 %v1635_v27  ;;  %1657 = vmatpush.bf16.msra.mxu1 %v1635_v27 }
  0x29   : > { %v1940_v33 = vld [vmem:[#allocation2 + $0x2f] sm:$0xff]  ;;  %v752_v36 = vmul.f32 %v1924_v26, %v1937_v32  ;;  %v753_v41 = vmul.f32 %v1924_v26, %v1944_v35  ;;  %v1963_v43 = vld [vmem:[#allocation2 + $0x47] sm:$0xff]  ;;  %240 = vst [vmem:[#allocation2 + $0x88] sm:$0xff] %v1778_v1  ;;  %1658 = vmatpush.bf16.msra.mxu2 %v1635_v27  ;;  %1659 = vmatpush.bf16.msra.mxu3 %v1635_v27  ;;  %v310_v27 = vld [vmem:[%s1892_s17 + $0x78] sm:$0xff] }
  0x2a   : > { %v1948_v37 = vld [vmem:[#allocation2 + $0x29] sm:$0xff]  ;;  %v656_v40 = vmul.f32 %v1921_v25, %v1940_v33  ;;  %v1961_v42 = vld [vmem:[#allocation2 + $0x31] sm:$0xff]  ;;  %v687_v44 = vadd.f32 %v655_v34, %v590_v28  ;;  %241 = vst [vmem:[#allocation2 + $0x90] sm:$0xff] %v1778_v1  ;;  %v947_v52 = vmul.f32 %v1951_v38, %v1963_v43  ;;  %v398_v34 = vmul.f32 %v1935_v31, %v1883_v5 }
  0x2b   : > { %v849_v45 = vmul.f32 %v1932_v29, %v1948_v37  ;;  %v1968_v46 = vld [vmem:[#allocation2 + $0x4f] sm:$0xff]  ;;  %v850_v49 = vmul.f32 %v1932_v29, %v1961_v42  ;;  %242 = vst [vmem:[#allocation2 + $0x98] sm:$0xff] %v1778_v1 }
  0x2c   : > { %v688_v48 = vadd.f32 %v656_v40, %v591_v30  ;;  %v1976_v50 = vld [vmem:[#allocation2 + $0x48] sm:$0xff]  ;;  %v784_v51 = vadd.f32 %v752_v36, %v687_v44  ;;  %v1981_v53 = vld [vmem:[#allocation2 + $0x50] sm:$0xff]  ;;  %243 = vst [vmem:[#allocation2 + $0xa0] sm:$0xff] %v1778_v1  ;;  %1363 = vmatpush.bf16.msra.mxu0 %v1634_v39  ;;  %1660 = vmatpush.bf16.msra.mxu1 %v1634_v39 }
  0x2d   : > { %v948_v57 = vmul.f32 %v1951_v38, %v1968_v46  ;;  %v1994_v58 = vld [vmem:[#allocation2 + $0x49] sm:$0xff]  ;;  %244 = vst [vmem:[#allocation2 + $0xa8] sm:$0xff] %v1778_v1  ;;  %1661 = vmatpush.bf16.msra.mxu2 %v1634_v39  ;;  %1662 = vmatpush.bf16.msra.mxu3 %v1634_v39  ;;  %v1044_v60 = vmul.f32 %v1971_v47, %v1976_v50  ;;  %v1999_v61 = vld [vmem:[#allocation2 + $0x51] sm:$0xff] }
  0x2e   : > { %v785_v56 = vadd.f32 %v753_v41, %v688_v48  ;;  %v881_v59 = vadd.f32 %v849_v45, %v784_v51  ;;  %245 = vst [vmem:[#allocation2 + $0xb0] sm:$0xff] %v1778_v1  ;;  %v1045_v63 = vmul.f32 %v1971_v47, %v1981_v53  ;;  %v1141_v2 = vmul.f32 %v1986_v54, %v1994_v58  ;;  %v312_v28 = vld [vmem:[%s1892_s17 + $0x88] sm:$0xff]  ;;  %v313_v30 = vld [vmem:[%s1892_s17 + $0x90] sm:$0xff]  ;;  %v314_v45 = vld [vmem:[%s1892_s17 + $0x98] sm:$0xff] }
  0x2f   : > { %246 = vst [vmem:[#allocation2 + $0xb8] sm:$0xff] %v1778_v1  ;;  %v1142_v4 = vmul.f32 %v1986_v54, %v1999_v61  ;;  %v399_v36 = vmul.f32 %v1940_v33, %v1883_v5  ;;  %v463_v39 = vmul.f32 %v1937_v32, %v1886_v6  ;;  %v464_v40 = vmul.f32 %v1944_v35, %v1886_v6  ;;  %v317_v48 = vld [vmem:[%s1892_s17 + $0xb0] sm:$0xff]  ;;  %v318_v51 = vld [vmem:[%s1892_s17 + $0xb8] sm:$0xff] }
  0x30   : > { %v882_v62 = vadd.f32 %v850_v49, %v785_v56  ;;  %v979_v0 = vadd.f32 %v947_v52, %v881_v59  ;;  %247 = vst [vmem:[#allocation2 + $0xc0] sm:$0xff] %v1778_v1  ;;  %1364 = vmatpush.bf16.msra.mxu0 %v1633_v55  ;;  %1663 = vmatpush.bf16.msra.mxu1 %v1633_v55 }
  0x31   : > { %248 = vst [vmem:[#allocation2 + $0xc8] sm:$0xff] %v1778_v1  ;;  %1664 = vmatpush.bf16.msra.mxu2 %v1633_v55  ;;  %1665 = vmatpush.bf16.msra.mxu3 %v1633_v55  ;;  %v2109_v52 = vadd.f32 %v463_v39, %v398_v34  ;;  %v2111_v55 = vadd.f32 %v464_v40, %v399_v36  ;;  %v322_v34 = vld [vmem:[%s1892_s17 + $0xd8] sm:$0xff] }
  0x32   : > { %v980_v3 = vadd.f32 %v948_v57, %v882_v62  ;;  %v1076_v7 = vadd.f32 %v1044_v60, %v979_v0  ;;  %249 = vst [vmem:[#allocation2 + $0xd0] sm:$0xff] %v1778_v1  ;;  %v319_v0 = vld [vmem:[%s1892_s17 + $0xc0] sm:$0xff] }
  0x33   : > { %250 = vst [vmem:[#allocation2 + $0xd8] sm:$0xff] %v1778_v1 }
  0x34   : > { %v1077_v9 = vadd.f32 %v1045_v63, %v980_v3  ;;  %v1173_v10 = vadd.f32 %v1141_v2, %v1076_v7  ;;  %251 = vst [vmem:[#allocation2 + $0xe0] sm:$0xff] %v1778_v1  ;;  %v2129_v2 = vmul.f32 %v1948_v37, %v1905_v14  ;;  %v320_v37 = vld [vmem:[%s1892_s17 + $0xc8] sm:$0xff] }
  0x35   : > { %252 = vst [vmem:[#allocation2 + $0xe8] sm:$0xff] %v1778_v1 }
  0x36   : > { %v1174_v11 = vadd.f32 %v1142_v4, %v1077_v9  ;;  %v1209_v12 = vadd.f32 %v2014_v8, %v1173_v10  ;;  %253 = vst [vmem:[#allocation2 + $0xf0] sm:$0xff] %v1778_v1 }
  0x37   : > { %254 = vst [vmem:[#allocation2 + $0xf8] sm:$0xff] %v1778_v1 }
  0x38   : > { %v1210_v13 = vadd.f32 %v2014_v8, %v1174_v11  ;;  %v1241_v15 = vmax.f32 %v1209_v12, 0.0  ;;  %255 = vst [vmem:[#allocation2 + $0x100] sm:$0xff] %v1778_v1 }
  0x39   : > { %256 = vst [vmem:[#allocation2 + $0x108] sm:$0xff] %v1778_v1 }
  0x3a   : > { %v1242_v16 = vmax.f32 %v1210_v13, 0.0  ;;  %257 = vst [vmem:[#allocation2 + $0x110] sm:$0xff] %v1778_v1 }
  0x3b   : > { %258 = vst [vmem:[#allocation2 + $0x118] sm:$0xff] %v1778_v1 }
  0x3c   : > { %v1273_v17 = vpack.c.bf16 %v1242_v16, %v1241_v15  ;;  %259 = vst [vmem:[#allocation2 + $0x120] sm:$0xff] %v1778_v1 }
  0x3d   : > { %260 = vst [vmem:[#allocation2 + $0x128] sm:$0xff] %v1778_v1 }
  0x3e   : > { %1365 = vmatmul.bf16.vlgmr.msra.gmra.mxu0 %v1273_v17  ;;  %261 = vst [vmem:[#allocation2 + $0x130] sm:$0xff] %v1778_v1 }
  0x3f   : > { %262 = vst [vmem:[#allocation2 + $0x138] sm:$0xff] %v1778_v1 }
  0x40   : > { %263 = vst [vmem:[#allocation2 + $0x140] sm:$0xff] %v1778_v1 }
  0x41   : > { %264 = vst [vmem:[#allocation2 + $0x148] sm:$0xff] %v1778_v1 }
  0x42   : > { %265 = vst [vmem:[#allocation2 + $0x150] sm:$0xff] %v1778_v1 }
  0x43   : > { %266 = vst [vmem:[#allocation2 + $0x158] sm:$0xff] %v1778_v1 }
  0x44   : > { %267 = vst [vmem:[#allocation2 + $0x160] sm:$0xff] %v1778_v1 }
  0x45   : > { %268 = vst [vmem:[#allocation2 + $0x168] sm:$0xff] %v1778_v1 }
  0x46   : > { %269 = vst [vmem:[#allocation2 + $0x170] sm:$0xff] %v1778_v1 }
  0x47   : > { %270 = vst [vmem:[#allocation2 + $0x178] sm:$0xff] %v1778_v1 }
  0x48   : > { %271 = vst [vmem:[#allocation2 + $0x180] sm:$0xff] %v1778_v1 }
  0x49   : > { %272 = vst [vmem:[#allocation2 + $0x188] sm:$0xff] %v1778_v1 }
  0x4a   : > { %273 = vst [vmem:[#allocation2 + $0x190] sm:$0xff] %v1778_v1 }
  0x4b   : > { %274 = vst [vmem:[#allocation2 + $0x198] sm:$0xff] %v1778_v1 }
  0x4c   : > { %275 = vst [vmem:[#allocation2 + $0x1a0] sm:$0xff] %v1778_v1 }
  0x4d   : > { %276 = vst [vmem:[#allocation2 + $0x1a8] sm:$0xff] %v1778_v1 }
  0x4e   : > { %277 = vst [vmem:[#allocation2 + $0x1b0] sm:$0xff] %v1778_v1 }
  0x4f   : > { %278 = vst [vmem:[#allocation2 + $0x1b8] sm:$0xff] %v1778_v1 }
  0x50   : > { %279 = vst [vmem:[#allocation2 + $0x1c0] sm:$0xff] %v1778_v1 }
  0x51   : > { %280 = vst [vmem:[#allocation2 + $0x1c8] sm:$0xff] %v1778_v1 }
  0x52   : > { %281 = vst [vmem:[#allocation2 + $0x1d0] sm:$0xff] %v1778_v1 }
  0x53   : > { %282 = vst [vmem:[#allocation2 + $0x1d8] sm:$0xff] %v1778_v1 }
  0x54   : > { %283 = vst [vmem:[#allocation2 + $0x1e0] sm:$0xff] %v1778_v1 }
  0x55   : > { %284 = vst [vmem:[#allocation2 + $0x1e8] sm:$0xff] %v1778_v1 }
  0x56   : > { %285 = vst [vmem:[#allocation2 + $0x1f0] sm:$0xff] %v1778_v1 }
  0x57   : > { %286 = vst [vmem:[#allocation2 + $0x1f8] sm:$0xff] %v1778_v1 }
  0x58   : > { %287 = vst [vmem:[#allocation2 + $0x200] sm:$0xff] %v1778_v1 }
  0x59   : > { %288 = vst [vmem:[#allocation2 + $0x208] sm:$0xff] %v1778_v1 }
  0x5a   : > { %289 = vst [vmem:[#allocation2 + $0x210] sm:$0xff] %v1778_v1 }
  0x5b   : > { %290 = vst [vmem:[#allocation2 + $0x218] sm:$0xff] %v1778_v1 }
  0x5c   : > { %291 = vst [vmem:[#allocation2 + $0x220] sm:$0xff] %v1778_v1 }
  0x5d   : > { %292 = vst [vmem:[#allocation2 + $0x228] sm:$0xff] %v1778_v1 }
  0x5e   : > { %293 = vst [vmem:[#allocation2 + $0x230] sm:$0xff] %v1778_v1 }
  0x5f   : > { %294 = vst [vmem:[#allocation2 + $0x238] sm:$0xff] %v1778_v1  ;;  %v311_v1 = vld [vmem:[%s1892_s17 + $0x80] sm:$0xff] }
  0x60   : > { %335 = vst.msk [vmem:[#allocation2 + $0x88] sm:$0xff] %vm328_vm0, %v301_v18 }
  0x61   : > { %336 = vst.msk [vmem:[#allocation2 + $0x90] sm:$0xff] %vm328_vm0, %v302_v19 }
  0x62   : > { %337 = vst.msk [vmem:[#allocation2 + $0xa8] sm:$0xff] %vm328_vm0, %v303_v20 }
  0x63   : > { %338 = vst.msk [vmem:[#allocation2 + $0xb0] sm:$0xff] %vm328_vm0, %v304_v21  ;;  %v321_v21 = vld [vmem:[%s1892_s17 + $0xd0] sm:$0xff] }
  0x64   : > { %339 = vst.msk [vmem:[#allocation2 + $0xc8] sm:$0xff] %vm328_vm0, %v305_v22 }
  0x65   : > { %340 = vst.msk [vmem:[#allocation2 + $0xd0] sm:$0xff] %vm328_vm0, %v306_v23 }
  0x66   : > { %343 = vst.msk [vmem:[#allocation2 + $0x108] sm:$0xff] %vm328_vm0, %v309_v24 }
  0x67   : > { %v2090_v41 = vld [vmem:[#allocation2 + $0x87] sm:$0xff]  ;;  %344 = vst.msk [vmem:[#allocation2 + $0x110] sm:$0xff] %vm328_vm0, %v310_v27 }
  0x68   : > { %3033 = vst [vmem:[#allocation6_spill] sm:$0xff] %v2090_v41  ;;  %v2092_v44 = vld [vmem:[#allocation2 + $0x88] sm:$0xff]  ;;  %v404_v31 = vmul.f32 %v1883_v5, %v2090_v41  ;;  %v2101_v33 = vld [vmem:[#allocation2 + $0x90] sm:$0xff] }
  0x69   : > { %3034 = vst [vmem:[#allocation7_spill] sm:$0xff] %v2092_v44  ;;  %v2097_v49 = vld [vmem:[#allocation2 + $0x8f] sm:$0xff]  ;;  %v469_v32 = vmul.f32 %v1886_v6, %v2092_v44  ;;  %v470_v57 = vmul.f32 %v1886_v6, %v2101_v33  ;;  %v2121_v62 = vld [vmem:[#allocation2 + $0xa7] sm:$0xff] }
  0x6a   : > { %3035 = vst [vmem:[#allocation8_spill] sm:$0xff] %v2097_v49  ;;  %v2105_v35 = vld [vmem:[#allocation2 + $0x89] sm:$0xff]  ;;  %v405_v56 = vmul.f32 %v1883_v5, %v2097_v49  ;;  %v2117_v59 = vld [vmem:[#allocation2 + $0x91] sm:$0xff]  ;;  %v663_v9 = vmul.f32 %v1921_v25, %v2121_v62 }
  0x6b   : > { %3036 = vst [vmem:[#allocation9_spill] sm:$0xff] %v2101_v33  ;;  %v566_v60 = vmul.f32 %v1905_v14, %v2105_v35  ;;  %v2123_v63 = vld [vmem:[#allocation2 + $0xa8] sm:$0xff]  ;;  %v501_v3 = vadd.f32 %v469_v32, %v404_v31  ;;  %v567_v4 = vmul.f32 %v1905_v14, %v2117_v59  ;;  %v2137_v10 = vld [vmem:[#allocation2 + $0xb0] sm:$0xff] }
  0x6c   : > { %3037 = vst [vmem:[#allocation10_spill] sm:$0xff] %v2105_v35  ;;  %v2133_v7 = vld [vmem:[#allocation2 + $0xaf] sm:$0xff]  ;;  %v760_v11 = vmul.f32 %v1924_v26, %v2123_v63  ;;  %v502_v13 = vadd.f32 %v470_v57, %v405_v56  ;;  %v761_v16 = vmul.f32 %v1924_v26, %v2137_v10  ;;  %v2153_v19 = vld [vmem:[#allocation2 + $0xc7] sm:$0xff] }
  0x6d   : > { %345 = vst.msk [vmem:[#allocation2 + $0x128] sm:$0xff] %vm328_vm0, %v311_v1  ;;  %v2141_v12 = vld [vmem:[#allocation2 + $0xa9] sm:$0xff]  ;;  %v664_v15 = vmul.f32 %v1921_v25, %v2133_v7  ;;  %v2149_v17 = vld [vmem:[#allocation2 + $0xb1] sm:$0xff]  ;;  %v598_v22 = vadd.f32 %v566_v60, %v501_v3  ;;  %v955_v27 = vmul.f32 %v1951_v38, %v2153_v19 }
  0x6e   : > { %3038 = vst [vmem:[#allocation11_spill] sm:$0xff] %v2117_v59  ;;  %v857_v18 = vmul.f32 %v1932_v29, %v2141_v12  ;;  %v2155_v20 = vld [vmem:[#allocation2 + $0xc8] sm:$0xff]  ;;  %v858_v23 = vmul.f32 %v1932_v29, %v2149_v17  ;;  %v2165_v1 = vld [vmem:[#allocation2 + $0xd0] sm:$0xff]  ;;  %v599_v36 = vadd.f32 %v567_v4, %v502_v13 }
  0x6f   : > { %346 = vst.msk [vmem:[#allocation2 + $0x130] sm:$0xff] %vm328_vm0, %v312_v28  ;;  %v2161_v24 = vld [vmem:[#allocation2 + $0xcf] sm:$0xff]  ;;  %v2169_v28 = vmul.f32 %v1971_v47, %v2155_v20  ;;  %v2179_v40 = vmul.f32 %v1971_v47, %v2165_v1  ;;  %v2187_v32 = vld [vmem:[#allocation2 + $0x107] sm:$0xff]  ;;  %v695_v57 = vadd.f32 %v663_v9, %v598_v22 }
  0x70   : > { %347 = vst.msk [vmem:[#allocation2 + $0x148] sm:$0xff] %vm328_vm0, %v313_v30  ;;  %v2171_v30 = vld [vmem:[#allocation2 + $0xc9] sm:$0xff]  ;;  %v956_v39 = vmul.f32 %v1951_v38, %v2161_v24  ;;  %v412_v4 = vmul.f32 %v1883_v5, %v2187_v32  ;;  %v2212_v33 = vld [vmem:[#allocation2 + $0x111] sm:$0xff] }
  0x71   : > { %348 = vst.msk [vmem:[#allocation2 + $0x150] sm:$0xff] %vm328_vm0, %v314_v45  ;;  %v2181_v45 = vld [vmem:[#allocation2 + $0xd1] sm:$0xff]  ;;  %v2185_v31 = vmul.f32 %v1986_v54, %v2171_v30  ;;  %v2189_v56 = vld [vmem:[#allocation2 + $0x108] sm:$0xff] }
  0x72   : > { %351 = vst.msk [vmem:[#allocation2 + $0x188] sm:$0xff] %vm328_vm0, %v317_v48  ;;  %v299_v48 = vld [vmem:[%s1892_s17 + $0x20] sm:$0xff]  ;;  %v2195_v60 = vmul.f32 %v1986_v54, %v2181_v45  ;;  %v2197_v3 = vld [vmem:[#allocation2 + $0x10f] sm:$0xff]  ;;  %v477_v59 = vmul.f32 %v1886_v6, %v2189_v56 }
  0x73   : > { %3039 = vst [vmem:[#allocation12_spill] sm:$0xff] %v2181_v45  ;;  %v2201_v13 = vld [vmem:[#allocation2 + $0x110] sm:$0xff]  ;;  %v413_v9 = vmul.f32 %v1883_v5, %v2197_v3 }
  0x74   : > { %3040 = vst [vmem:[#allocation13_spill] sm:$0xff] %v2187_v32  ;;  %v2205_v35 = vld [vmem:[#allocation2 + $0x109] sm:$0xff]  ;;  %v478_v22 = vmul.f32 %v1886_v6, %v2201_v13 }
  0x75   : > { %3041 = vst [vmem:[#allocation14_spill] sm:$0xff] %v2189_v56  ;;  %v574_v32 = vmul.f32 %v1905_v14, %v2205_v35  ;;  %v2216_v44 = vld [vmem:[#allocation2 + $0x127] sm:$0xff]  ;;  %v792_v56 = vadd.f32 %v760_v11, %v695_v57 }
  0x76   : > { %352 = vst.msk [vmem:[#allocation2 + $0x190] sm:$0xff] %vm328_vm0, %v318_v51  ;;  %v696_v51 = vadd.f32 %v664_v15, %v599_v36  ;;  %v2218_v49 = vld [vmem:[#allocation2 + $0x128] sm:$0xff]  ;;  %v575_v15 = vmul.f32 %v1905_v14, %v2212_v33  ;;  %v510_v45 = vadd.f32 %v478_v22, %v413_v9 }
  0x77   : > { %3042 = vst [vmem:[#allocation15_spill] sm:$0xff] %v2197_v3  ;;  %v2223_v36 = vld [vmem:[#allocation2 + $0x12f] sm:$0xff]  ;;  %v2238_v57 = vld [vmem:[#allocation2 + $0x147] sm:$0xff] }
  0x78   : > { %3043 = vst [vmem:[#allocation16_spill] sm:$0xff] %v2201_v13  ;;  %v671_v13 = vmul.f32 %v1921_v25, %v2216_v44  ;;  %v2227_v3 = vld [vmem:[#allocation2 + $0x130] sm:$0xff]  ;;  %v672_v11 = vmul.f32 %v1921_v25, %v2223_v36 }
  0x79   : > { %3044 = vst [vmem:[#allocation17_spill] sm:$0xff] %v2205_v35  ;;  %v2229_v41 = vld [vmem:[#allocation2 + $0x129] sm:$0xff]  ;;  %v793_v35 = vadd.f32 %v761_v16, %v696_v51  ;;  %v769_v16 = vmul.f32 %v1924_v26, %v2227_v3 }
  0x7a   : > { %353 = vst.msk [vmem:[#allocation2 + $0x1a8] sm:$0xff] %vm328_vm0, %v319_v0  ;;  %v509_v0 = vadd.f32 %v477_v59, %v412_v4  ;;  %v768_v59 = vmul.f32 %v1924_v26, %v2218_v49  ;;  %v2240_v4 = vld [vmem:[#allocation2 + $0x148] sm:$0xff]  ;;  %v2249_v9 = vld [vmem:[#allocation2 + $0x150] sm:$0xff] }
  0x7b   : > { %3045 = vst [vmem:[#allocation18_spill] sm:$0xff] %v2212_v33  ;;  %v889_v33 = vadd.f32 %v857_v18, %v792_v56  ;;  %v2247_v51 = vld [vmem:[#allocation2 + $0x14f] sm:$0xff]  ;;  %v2260_v56 = vld [vmem:[#allocation2 + $0x187] sm:$0xff] }
  0x7c   : > { %3046 = vst [vmem:[#allocation19_spill] sm:$0xff] %v2216_v44  ;;  %v606_v44 = vadd.f32 %v574_v32, %v509_v0  ;;  %v2251_v22 = vld [vmem:[#allocation2 + $0x149] sm:$0xff]  ;;  %v2258_v32 = vld [vmem:[#allocation2 + $0x151] sm:$0xff] }
  0x7d   : > { %3047 = vst [vmem:[#allocation20_spill] sm:$0xff] %v2218_v49  ;;  %v890_v49 = vadd.f32 %v858_v23, %v793_v35  ;;  %v987_v0 = vadd.f32 %v955_v27, %v889_v33  ;;  %v2266_v35 = vld [vmem:[#allocation2 + $0x18f] sm:$0xff] }
  0x7e   : > { %354 = vst.msk [vmem:[#allocation2 + $0x1b0] sm:$0xff] %vm328_vm0, %v320_v37  ;;  %v2236_v37 = vld [vmem:[#allocation2 + $0x131] sm:$0xff]  ;;  %v2268_v23 = vld [vmem:[#allocation2 + $0x188] sm:$0xff] }
  0x7f   : > { %3048 = vst [vmem:[#allocation21_spill] sm:$0xff] %v2223_v36  ;;  %v607_v36 = vadd.f32 %v575_v15, %v510_v45  ;;  %v866_v18 = vmul.f32 %v1932_v29, %v2236_v37  ;;  %v988_v45 = vadd.f32 %v956_v39, %v890_v49  ;;  %v2274_v33 = vld [vmem:[#allocation2 + $0x190] sm:$0xff]  ;;  %v1084_v27 = vadd.f32 %v2169_v28, %v987_v0 }
  0x80   : > { %3049 = vst [vmem:[#allocation22_spill] sm:$0xff] %v2227_v3  ;;  %v964_v3 = vmul.f32 %v1951_v38, %v2247_v51  ;;  %v420_v49 = vmul.f32 %v1883_v5, %v2260_v56  ;;  %v2283_v39 = vld [vmem:[#allocation2 + $0x191] sm:$0xff]  ;;  %v486_v0 = vmul.f32 %v1886_v6, %v2274_v33 }
  0x81   : > { %3050 = vst [vmem:[#allocation23_spill] sm:$0xff] %v2229_v41  ;;  %v704_v15 = vadd.f32 %v672_v11, %v607_v36  ;;  %v1085_v36 = vadd.f32 %v2179_v40, %v988_v45  ;;  %v2290_v28 = vld [vmem:[#allocation2 + $0x1a7] sm:$0xff] }
  0x82   : > { %355 = vst.msk [vmem:[#allocation2 + $0x1c8] sm:$0xff] %vm328_vm0, %v321_v21  ;;  %v865_v21 = vmul.f32 %v1932_v29, %v2229_v41  ;;  %v703_v41 = vadd.f32 %v671_v13, %v606_v44  ;;  %v2276_v44 = vld [vmem:[#allocation2 + $0x189] sm:$0xff] }
  0x83   : > { %3051 = vst [vmem:[#allocation24_spill] sm:$0xff] %v2236_v37  ;;  %v1157_v37 = vmul.f32 %v1986_v54, %v2251_v22  ;;  %v801_v11 = vadd.f32 %v769_v16, %v704_v15  ;;  %v582_v40 = vmul.f32 %v1905_v14, %v2276_v44  ;;  %v1182_v45 = vadd.f32 %v2195_v60, %v1085_v36 }
  0x84   : > { %3052 = vst [vmem:[#allocation25_spill] sm:$0xff] %v2238_v57  ;;  %v800_v13 = vadd.f32 %v768_v59, %v703_v41  ;;  %v1181_v41 = vadd.f32 %v2185_v31, %v1084_v27 }
  0x85   : > { %3053 = vst [vmem:[#allocation26_spill] sm:$0xff] %v2240_v4  ;;  %v2297_v16 = vld [vmem:[#allocation2 + $0x1af] sm:$0xff]  ;;  %v898_v15 = vadd.f32 %v866_v18, %v801_v11 }
  0x86   : > { %356 = vst.msk [vmem:[#allocation2 + $0x1d0] sm:$0xff] %vm328_vm0, %v322_v34  ;;  %v963_v34 = vmul.f32 %v1951_v38, %v2238_v57  ;;  %v1061_v57 = vmul.f32 %v1971_v47, %v2249_v9  ;;  %v897_v59 = vadd.f32 %v865_v21, %v800_v13  ;;  %v2304_v31 = vld [vmem:[#allocation2 + $0x1b0] sm:$0xff]  ;;  %v300_v21 = vld [vmem:[%s1892_s17 + $0x28] sm:$0xff]  ;;  %v1217_v27 = vadd.f32 %v2014_v8, %v1181_v41 }
  0x87   : > { %3054 = vst [vmem:[#allocation27_spill] sm:$0xff] %v2249_v9  ;;  %v485_v9 = vmul.f32 %v1886_v6, %v2268_v23  ;;  %v2310_v60 = vld [vmem:[#allocation2 + $0x1a9] sm:$0xff]  ;;  %v996_v36 = vadd.f32 %v964_v3, %v898_v15  ;;  %v2318_v41 = vld [vmem:[#allocation2 + $0x1b1] sm:$0xff]  ;;  %v323_v3 = vld [vmem:[%s1892_s17 + $0xe0] sm:$0xff]  ;;  %v777_v15 = vmul.f32 %v1924_v26, %v2304_v31 }
  0x88   : > { %3055 = vst [vmem:[#allocation28_spill] sm:$0xff] %v2251_v22  ;;  %v421_v22 = vmul.f32 %v1883_v5, %v2266_v35  ;;  %v995_v13 = vadd.f32 %v963_v34, %v897_v59  ;;  %v308_v18 = vld [vmem:[%s1892_s17 + $0x68] sm:$0xff]  ;;  %v1249_v59 = vmax.f32 %v1217_v27, 0.0  ;;  %v873_v27 = vmul.f32 %v1932_v29, %v2310_v60 }
  0x89   : > { %333 = vst.msk [vmem:[#allocation2 + $0x68] sm:$0xff] %vm328_vm0, %v299_v48  ;;  %v1060_v48 = vmul.f32 %v1971_v47, %v2240_v4  ;;  %v1158_v4 = vmul.f32 %v1986_v54, %v2258_v32  ;;  %v316_v34 = vld [vmem:[%s1892_s17 + $0xa8] sm:$0xff] }
  0x8a   : > { %3056 = vst [vmem:[#allocation29_spill] sm:$0xff] %v2258_v32  ;;  %v2325_v32 = vld [vmem:[#allocation2 + $0x1c7] sm:$0xff] }
  0x8b   : > { %3057 = vst [vmem:[#allocation30_spill] sm:$0xff] %v2260_v56  ;;  %v2302_v56 = vld [vmem:[#allocation2 + $0x1a8] sm:$0xff] }
  0x8c   : > { %3058 = vst [vmem:[#allocation31_spill] sm:$0xff] %v2266_v35  ;;  %v517_v35 = vadd.f32 %v485_v9, %v420_v49  ;;  %v307_v9 = vld [vmem:[%s1892_s17 + $0x60] sm:$0xff]  ;;  %v1218_v49 = vadd.f32 %v2014_v8, %v1182_v45 }
  0x8d   : > { %3059 = vst [vmem:[#allocation32_spill] sm:$0xff] %v2268_v23  ;;  %v583_v23 = vmul.f32 %v1905_v14, %v2283_v39 }
  0x8e   : > { %3060 = vst [vmem:[#allocation33_spill] sm:$0xff] %v2274_v33  ;;  %v679_v33 = vmul.f32 %v1921_v25, %v2290_v28  ;;  %v614_v11 = vadd.f32 %v582_v40, %v517_v35  ;;  %v1250_v35 = vmax.f32 %v1218_v49, 0.0  ;;  %v1093_v40 = vadd.f32 %v1061_v57, %v996_v36  ;;  %v2341_v57 = vld [vmem:[#allocation2 + $0x1d0] sm:$0xff] }
  0x8f   : > { %3061 = vst [vmem:[#allocation34_spill] sm:$0xff] %v2276_v44  ;;  %v518_v44 = vadd.f32 %v486_v0, %v421_v22  ;;  %v315_v22 = vld [vmem:[%s1892_s17 + $0xa0] sm:$0xff]  ;;  %v1092_v0 = vadd.f32 %v1060_v48, %v995_v13  ;;  %v324_v48 = vld [vmem:[%s1892_s17 + $0xe8] sm:$0xff]  ;;  %v874_v13 = vmul.f32 %v1932_v29, %v2318_v41 }
  0x90   : > { %3062 = vst [vmem:[#allocation35_spill] sm:$0xff] %v2283_v39  ;;  %v680_v39 = vmul.f32 %v1921_v25, %v2297_v16  ;;  %v711_v45 = vadd.f32 %v679_v33, %v614_v11  ;;  %v2343_v33 = vld [vmem:[#allocation2 + $0x1c9] sm:$0xff]  ;;  %v1190_v49 = vadd.f32 %v1158_v4, %v1093_v40  ;;  %v971_v11 = vmul.f32 %v1951_v38, %v2325_v32 }
  0x91   : > { %3063 = vst [vmem:[#allocation36_spill] sm:$0xff] %v2290_v28  ;;  %v776_v28 = vmul.f32 %v1924_v26, %v2302_v56 }
  0x92   : > { %3064 = vst [vmem:[#allocation37_spill] sm:$0xff] %v2297_v16  ;;  %v2333_v16 = vld [vmem:[#allocation2 + $0x1c8] sm:$0xff]  ;;  %v1226_v4 = vadd.f32 %v2014_v8, %v1190_v49  ;;  %v754_v49 = vmul.f32 %v1976_v50, %v1924_v26  ;;  %v852_v50 = vmul.f32 %v1999_v61, %v1932_v29 }
  0x93   : > { %334 = vst.msk [vmem:[#allocation2 + $0x70] sm:$0xff] %vm328_vm0, %v300_v21  ;;  %v615_v21 = vadd.f32 %v583_v23, %v518_v44  ;;  %v1189_v23 = vadd.f32 %v1157_v37, %v1092_v0  ;;  %v808_v36 = vadd.f32 %v776_v28, %v711_v45  ;;  %v2348_v37 = vld [vmem:[#allocation2 + $0x1d1] sm:$0xff]  ;;  %v561_v45 = vmul.f32 %v1961_v42, %v1905_v14 }
  0x94   : > { %341 = vst.msk [vmem:[#allocation2 + $0xe8] sm:$0xff] %vm328_vm0, %v307_v9  ;;  %v2331_v9 = vld [vmem:[#allocation2 + $0x1cf] sm:$0xff]  ;;  %v1166_v40 = vmul.f32 %v1986_v54, %v2348_v37 }
  0x95   : > { %342 = vst.msk [vmem:[#allocation2 + $0xf0] sm:$0xff] %vm328_vm0, %v308_v18  ;;  %v712_v44 = vadd.f32 %v680_v39, %v615_v21  ;;  %v1277_v18 = vpack.c.bf16 %v1250_v35, %v1249_v59  ;;  %v1225_v39 = vadd.f32 %v2014_v8, %v1189_v23  ;;  %v972_v0 = vmul.f32 %v1951_v38, %v2331_v9 }
  0x96   : > { %349 = vst.msk [vmem:[#allocation2 + $0x168] sm:$0xff] %vm328_vm0, %v315_v22  ;;  %v1068_v21 = vmul.f32 %v1971_v47, %v2333_v16  ;;  %v905_v28 = vadd.f32 %v873_v27, %v808_v36  ;;  %v1165_v59 = vmul.f32 %v1986_v54, %v2343_v33  ;;  %v592_v23 = vadd.f32 %v2129_v2, %v2109_v52  ;;  %v2375_v36 = vld [vmem:[#allocation2 + $0x67] sm:$0xff] }
  0x97   : > { %3065 = vst [vmem:[#allocation38_spill] sm:$0xff] %v2343_v33  ;;  %v809_v22 = vadd.f32 %v777_v15, %v712_v44  ;;  %1385 = vmatmul.bf16.vlgmr.msra.gmra.mxu1 %v1277_v18  ;;  %v1258_v15 = vmax.f32 %v1226_v4, 0.0  ;;  %v657_v44 = vmul.f32 %v1963_v43, %v1921_v25  ;;  %v593_v18 = vadd.f32 %v561_v45, %v2111_v55  ;;  %v2381_v43 = vld [vmem:[#allocation2 + $0x68] sm:$0xff] }
  0x98   : > { %350 = vst.msk [vmem:[#allocation2 + $0x170] sm:$0xff] %vm328_vm0, %v316_v34  ;;  %v1069_v34 = vmul.f32 %v1971_v47, %v2341_v57  ;;  %v755_v52 = vmul.f32 %v1981_v53, %v1924_v26  ;;  %v949_v53 = vmul.f32 %v1951_v38, %v2375_v36 }
  0x99   : > { %3066 = vst [vmem:[#allocation39_spill] sm:$0xff] %v2348_v37  ;;  %v906_v35 = vadd.f32 %v874_v13, %v809_v22  ;;  %v658_v13 = vmul.f32 %v1968_v46, %v1921_v25  ;;  %v689_v22 = vadd.f32 %v657_v44, %v592_v23  ;;  %v851_v46 = vmul.f32 %v1994_v58, %v1932_v29 }
  0x9a   : > { %357 = vst.msk [vmem:[#allocation2 + $0x1e8] sm:$0xff] %vm328_vm0, %v323_v3  ;;  %v1257_v3 = vmax.f32 %v1225_v39, 0.0  ;;  %v2377_v42 = vld [vmem:[#allocation2 + $0x6f] sm:$0xff]  ;;  %v1046_v58 = vmul.f32 %v1971_v47, %v2381_v43 }
  0x9b   : > { %358 = vst.msk [vmem:[#allocation2 + $0x1f0] sm:$0xff] %vm328_vm0, %v324_v48  ;;  %v1003_v48 = vadd.f32 %v971_v11, %v905_v28  ;;  %v1004_v27 = vadd.f32 %v972_v0, %v906_v35  ;;  %v2383_v2 = vld [vmem:[#allocation2 + $0x70] sm:$0xff]  ;;  %v690_v0 = vadd.f32 %v658_v13, %v593_v18  ;;  %v407_v18 = vmul.f32 %v2133_v7, %v1883_v5 }
  0x9c   : > { %v1281_v11 = vpack.c.bf16 %v1258_v15, %v1257_v3  ;;  %v2389_v4 = vld [vmem:[#allocation2 + $0x69] sm:$0xff]  ;;  %v2391_v28 = vld [vmem:[#allocation2 + $0x71] sm:$0xff]  ;;  %v786_v3 = vadd.f32 %v754_v49, %v689_v22  ;;  %v1047_v61 = vmul.f32 %v1971_v47, %v2383_v2  ;;  %v665_v7 = vmul.f32 %v2153_v19, %v1921_v25 }
  0x9d   : > { %v1100_v39 = vadd.f32 %v1068_v21, %v1003_v48  ;;  %v1101_v55 = vadd.f32 %v1069_v34, %v1004_v27  ;;  %v950_v34 = vmul.f32 %v1951_v38, %v2377_v42  ;;  %v787_v45 = vadd.f32 %v755_v52, %v690_v0 }
  0x9e   : > { %1405 = vmatmul.bf16.vlgmr.msra.gmra.mxu2 %v1281_v11  ;;  %v883_v48 = vadd.f32 %v851_v46, %v786_v3  ;;  %v1144_v23 = vmul.f32 %v1986_v54, %v2391_v28  ;;  %v471_v11 = vmul.f32 %v2123_v63, %v1886_v6  ;;  %v569_v0 = vmul.f32 %v2149_v17, %v1905_v14 }
  0x9f   : > { %v1197_v21 = vadd.f32 %v1165_v59, %v1100_v39  ;;  %v1198_v35 = vadd.f32 %v1166_v40, %v1101_v55  ;;  %v1143_v59 = vmul.f32 %v1986_v54, %v2389_v4  ;;  %v884_v27 = vadd.f32 %v852_v50, %v787_v45 }
  0xa0   : > { %v406_v40 = vmul.f32 %v2121_v62, %v1883_v5  ;;  %v981_v49 = vadd.f32 %v949_v53, %v883_v48  ;;  %v472_v39 = vmul.f32 %v2137_v10, %v1886_v6  ;;  %v568_v55 = vmul.f32 %v2141_v12, %v1905_v14  ;;  %v2427_v12 = vld [vmem:[#allocation2 + $0xef] sm:$0xff] }
  0xa1   : > { %v1233_v15 = vadd.f32 %v2014_v8, %v1197_v21  ;;  %v1234_v44 = vadd.f32 %v2014_v8, %v1198_v35  ;;  %v982_v52 = vadd.f32 %v950_v34, %v884_v27  ;;  %v2421_v21 = vld [vmem:[#allocation2 + $0xe7] sm:$0xff]  ;;  %v666_v10 = vmul.f32 %v2161_v24, %v1921_v25  ;;  %3068 = vst [vmem:[#allocation41_spill] sm:$0xff] %v2427_v12  ;;  %v3072_v27 = vld [vmem:[#allocation12_spill] sm:$0xff] }
  0xa2   : > { %v1078_v62 = vadd.f32 %v1046_v58, %v981_v49  ;;  %v503_v46 = vadd.f32 %v471_v11, %v406_v40  ;;  %v504_v50 = vadd.f32 %v472_v39, %v407_v18  ;;  %3067 = vst [vmem:[#allocation40_spill] sm:$0xff] %v2421_v21  ;;  %v762_v53 = vmul.f32 %v2155_v20, %v1924_v26  ;;  %v2431_v58 = vld [vmem:[#allocation2 + $0xe8] sm:$0xff]  ;;  %v2443_v18 = vld [vmem:[#allocation2 + $0xf1] sm:$0xff] }
  0xa3   : > { %v1265_v13 = vmax.f32 %v1233_v15, 0.0  ;;  %v1266_v22 = vmax.f32 %v1234_v44, 0.0  ;;  %v1079_v3 = vadd.f32 %v1047_v61, %v982_v52  ;;  %v763_v45 = vmul.f32 %v2165_v1, %v1924_v26  ;;  %3069 = vst [vmem:[#allocation42_spill] sm:$0xff] %v2431_v58  ;;  %v2433_v15 = vld [vmem:[#allocation2 + $0xf0] sm:$0xff] }
  0xa4   : > { %v1175_v34 = vadd.f32 %v1143_v59, %v1078_v62  ;;  %v600_v17 = vadd.f32 %v568_v55, %v503_v46  ;;  %v601_v35 = vadd.f32 %v569_v0, %v504_v50  ;;  %3070 = vst [vmem:[#allocation43_spill] sm:$0xff] %v2433_v15  ;;  %v2435_v48 = vld [vmem:[#allocation2 + $0xe9] sm:$0xff]  ;;  %v859_v44 = vmul.f32 %v2171_v30, %v1932_v29 }
  0xa5   : > { %v1285_v63 = vpack.c.bf16 %v1266_v22, %v1265_v13  ;;  %3071 = vst [vmem:[#allocation44_spill] sm:$0xff] %v2435_v48  ;;  %v1176_v61 = vadd.f32 %v1144_v23, %v1079_v3  ;;  %v860_v40 = vmul.f32 %v3072_v27, %v1932_v29  ;;  %v957_v59 = vmul.f32 %v1951_v38, %v2421_v21 }
  0xa6   : > { %3073 = vst [vmem:[#allocation12_spill] sm:$0xff] %v2443_v18  ;;  %v1211_v13 = vadd.f32 %v2014_v8, %v1175_v34  ;;  %v697_v49 = vadd.f32 %v665_v7, %v600_v17  ;;  %v698_v11 = vadd.f32 %v666_v10, %v601_v35  ;;  %v958_v39 = vmul.f32 %v1951_v38, %v2427_v12  ;;  %v3075_v10 = vld [vmem:[#allocation21_spill] sm:$0xff]  ;;  %v3076_v17 = vld [vmem:[#allocation20_spill] sm:$0xff] }
  0xa7   : > { %1425 = vmatmul.bf16.vlgmr.msra.gmra.mxu3 %v1285_v63  ;;  %v1212_v23 = vadd.f32 %v2014_v8, %v1176_v61  ;;  %v1054_v22 = vmul.f32 %v1971_v47, %v2431_v58  ;;  %v1055_v52 = vmul.f32 %v1971_v47, %v2433_v15  ;;  %v1151_v55 = vmul.f32 %v1986_v54, %v2435_v48  ;;  %v3074_v63 = vld [vmem:[#allocation19_spill] sm:$0xff]  ;;  %v3077_v48 = vld [vmem:[#allocation22_spill] sm:$0xff] }
  0xa8   : > { %v1243_v0 = vmax.f32 %v1211_v13, 0.0  ;;  %v794_v62 = vadd.f32 %v762_v53, %v697_v49  ;;  %v795_v46 = vadd.f32 %v763_v45, %v698_v11  ;;  %v1152_v50 = vmul.f32 %v1986_v54, %v2443_v18  ;;  %v3078_v53 = vld [vmem:[#allocation23_spill] sm:$0xff] }
  0xa9   : > { %v1244_v7 = vmax.f32 %v1212_v23, 0.0  ;;  %v414_v3 = vmul.f32 %v3074_v63, %v1883_v5  ;;  %v415_v34 = vmul.f32 %v3075_v10, %v1883_v5  ;;  %v479_v35 = vmul.f32 %v3076_v17, %v1886_v6  ;;  %v3079_v23 = vld [vmem:[#allocation24_spill] sm:$0xff]  ;;  %v3080_v63 = vld [vmem:[#allocation25_spill] sm:$0xff] }
  0xaa   : > { %v891_v61 = vadd.f32 %v859_v44, %v794_v62  ;;  %v892_v15 = vadd.f32 %v860_v40, %v795_v46  ;;  %v480_v13 = vmul.f32 %v3077_v48, %v1886_v6  ;;  %v576_v45 = vmul.f32 %v3078_v53, %v1905_v14  ;;  %v2473_v40 = vld [vmem:[#allocation2 + $0x167] sm:$0xff]  ;;  %v2475_v48 = vld [vmem:[#allocation2 + $0x16f] sm:$0xff] }
  0xab   : > { %v1274_v49 = vpack.c.bf16 %v1244_v7, %v1243_v0  ;;  %v511_v11 = vadd.f32 %v479_v35, %v414_v3  ;;  %v577_v18 = vmul.f32 %v3079_v23, %v1905_v14  ;;  %v673_v58 = vmul.f32 %v3080_v63, %v1921_v25  ;;  %3081 = vst [vmem:[#allocation19_spill] sm:$0xff] %v2473_v40  ;;  %v2477_v62 = vld [vmem:[#allocation2 + $0x168] sm:$0xff]  ;;  %v3084_v46 = vld [vmem:[#allocation26_spill] sm:$0xff] }
  0xac   : > { %v989_v10 = vadd.f32 %v957_v59, %v891_v61  ;;  %v990_v12 = vadd.f32 %v958_v39, %v892_v15  ;;  %v512_v21 = vadd.f32 %v480_v13, %v415_v34  ;;  %v674_v44 = vmul.f32 %v2247_v51, %v1921_v25  ;;  %3082 = vst [vmem:[#allocation21_spill] sm:$0xff] %v2475_v48  ;;  %v3085_v3 = vld [vmem:[#allocation27_spill] sm:$0xff]  ;;  %v3086_v15 = vld [vmem:[#allocation28_spill] sm:$0xff]  ;;  %v3087_v13 = vld [vmem:[#allocation29_spill] sm:$0xff] }
  0xad   : > { %3083 = vst [vmem:[#allocation20_spill] sm:$0xff] %v2477_v62  ;;  %1370 = vmatmul.bf16.gmra.mxu0 %v1274_v49  ;;  %v608_v0 = vadd.f32 %v576_v45, %v511_v11  ;;  %v770_v7 = vmul.f32 %v3084_v46, %v1924_v26  ;;  %v771_v17 = vmul.f32 %v3085_v3, %v1924_v26  ;;  %v2485_v39 = vld [vmem:[#allocation2 + $0x170] sm:$0xff] }
  0xae   : > { %v867_v59 = vmul.f32 %v3086_v15, %v1932_v29  ;;  %v1086_v34 = vadd.f32 %v1054_v22, %v989_v10  ;;  %v1087_v35 = vadd.f32 %v1055_v52, %v990_v12  ;;  %v609_v61 = vadd.f32 %v577_v18, %v512_v21  ;;  %v2489_v23 = vld [vmem:[#allocation2 + $0x169] sm:$0xff]  ;;  %v2491_v45 = vld [vmem:[#allocation2 + $0x171] sm:$0xff] }
  0xaf   : > { %v868_v53 = vmul.f32 %v3087_v13, %v1932_v29  ;;  %3088 = vst [vmem:[#allocation22_spill] sm:$0xff] %v2491_v45  ;;  %v705_v49 = vadd.f32 %v673_v58, %v608_v0  ;;  %v965_v11 = vmul.f32 %v1951_v38, %v2473_v40  ;;  %v966_v15 = vmul.f32 %v1951_v38, %v2475_v48  ;;  %v3089_v40 = vld [vmem:[#allocation36_spill] sm:$0xff] }
  0xb0   : > { %v1062_v12 = vmul.f32 %v1971_v47, %v2477_v62  ;;  %v1183_v21 = vadd.f32 %v1151_v55, %v1086_v34  ;;  %v1184_v18 = vadd.f32 %v1152_v50, %v1087_v35  ;;  %v706_v22 = vadd.f32 %v674_v44, %v609_v61  ;;  %v3090_v50 = vld [vmem:[#allocation37_spill] sm:$0xff]  ;;  %v325_v34 = vld [vmem:[%s1892_s17 + $0xf0] sm:$0xff] }
  0xb1   : > { %v1063_v52 = vmul.f32 %v1971_v47, %v2485_v39  ;;  %v802_v10 = vadd.f32 %v770_v7, %v705_v49  ;;  %v1159_v58 = vmul.f32 %v1986_v54, %v2489_v23  ;;  %v1160_v0 = vmul.f32 %v1986_v54, %v2491_v45  ;;  %v326_v35 = vld [vmem:[%s1892_s17 + $0xf8] sm:$0xff]  ;;  %359 = vst.msk [vmem:[#allocation2 + $0x208] sm:$0xff] %vm328_vm0, %v325_v34  ;;  %v2537_v34 = vld [vmem:[#allocation2 + $0x1f0] sm:$0xff] }
  0xb2   : > { %v422_v13 = vmul.f32 %v3089_v40, %v1883_v5  ;;  %v1219_v48 = vadd.f32 %v2014_v8, %v1183_v21  ;;  %v1220_v62 = vadd.f32 %v2014_v8, %v1184_v18  ;;  %v803_v55 = vadd.f32 %v771_v17, %v706_v22  ;;  %360 = vst.msk [vmem:[#allocation2 + $0x210] sm:$0xff] %vm328_vm0, %v326_v35  ;;  %v2539_v35 = vld [vmem:[#allocation2 + $0x1e9] sm:$0xff] }
  0xb3   : > { %v423_v44 = vmul.f32 %v3090_v50, %v1883_v5  ;;  %v899_v7 = vadd.f32 %v867_v59, %v802_v10  ;;  %v487_v61 = vmul.f32 %v2302_v56, %v1886_v6  ;;  %v488_v49 = vmul.f32 %v2304_v31, %v1886_v6  ;;  %v2525_v31 = vld [vmem:[#allocation2 + $0x1e7] sm:$0xff]  ;;  %3094 = vst [vmem:[#allocation26_spill] sm:$0xff] %v2537_v34 }
  0xb4   : > { %v584_v40 = vmul.f32 %v2310_v60, %v1905_v14  ;;  %v1251_v21 = vmax.f32 %v1219_v48, 0.0  ;;  %v1252_v18 = vmax.f32 %v1220_v62, 0.0  ;;  %v900_v17 = vadd.f32 %v868_v53, %v803_v55  ;;  %3091 = vst [vmem:[#allocation23_spill] sm:$0xff] %v2525_v31  ;;  %v2531_v53 = vld [vmem:[#allocation2 + $0x1ef] sm:$0xff] }
  0xb5   : > { %v585_v22 = vmul.f32 %v2318_v41, %v1905_v14  ;;  %v997_v59 = vadd.f32 %v965_v11, %v899_v7  ;;  %v519_v10 = vadd.f32 %v487_v61, %v422_v13  ;;  %v520_v50 = vadd.f32 %v488_v49, %v423_v44  ;;  %3092 = vst [vmem:[#allocation24_spill] sm:$0xff] %v2531_v53  ;;  %v2535_v44 = vld [vmem:[#allocation2 + $0x1e8] sm:$0xff]  ;;  %v2547_v49 = vld [vmem:[#allocation2 + $0x1f1] sm:$0xff] }
  0xb6   : > { %v681_v56 = vmul.f32 %v2325_v32, %v1921_v25  ;;  %v1278_v45 = vpack.c.bf16 %v1252_v18, %v1251_v21  ;;  %v998_v60 = vadd.f32 %v966_v15, %v900_v17  ;;  %v682_v48 = vmul.f32 %v2331_v9, %v1921_v25  ;;  %3093 = vst [vmem:[#allocation25_spill] sm:$0xff] %v2535_v44 }
  0xb7   : > { %v778_v62 = vmul.f32 %v2333_v16, %v1924_v26  ;;  %v1094_v41 = vadd.f32 %v1062_v12, %v997_v59  ;;  %v616_v55 = vadd.f32 %v584_v40, %v519_v10  ;;  %v617_v11 = vadd.f32 %v585_v22, %v520_v50  ;;  %3095 = vst [vmem:[#allocation27_spill] sm:$0xff] %v2539_v35  ;;  %v367_v22 = vld [vmem:[#allocation2 + $0x47] sm:$0xff] }
  0xb8   : > { %v779_v13 = vmul.f32 %v2341_v57, %v1924_v26  ;;  %1390 = vmatmul.bf16.gmra.mxu1 %v1278_v45  ;;  %v1095_v15 = vadd.f32 %v1063_v52, %v998_v60  ;;  %v875_v7 = vmul.f32 %v2343_v33, %v1932_v29  ;;  %v876_v61 = vmul.f32 %v2348_v37, %v1932_v29  ;;  %v368_v45 = vld [vmem:[#allocation2 + $0x4f] sm:$0xff] }
  0xb9   : > { %v973_v12 = vmul.f32 %v1951_v38, %v2525_v31  ;;  %3096 = vst [vmem:[#allocation36_spill] sm:$0xff] %v2547_v49  ;;  %v1191_v40 = vadd.f32 %v1159_v58, %v1094_v41  ;;  %v713_v21 = vadd.f32 %v681_v56, %v616_v55  ;;  %v714_v18 = vadd.f32 %v682_v48, %v617_v11  ;;  %v432_v52 = vld [vmem:[#allocation2 + $0x48] sm:$0xff]  ;;  %v433_v31 = vld [vmem:[#allocation2 + $0x50] sm:$0xff] }
  0xba   : > { %v974_v17 = vmul.f32 %v1951_v38, %v2531_v53  ;;  %v1192_v59 = vadd.f32 %v1160_v0, %v1095_v15  ;;  %v1070_v10 = vmul.f32 %v1971_v47, %v2535_v44  ;;  %v1071_v50 = vmul.f32 %v1971_v47, %v2537_v34  ;;  %v529_v55 = vld [vmem:[#allocation2 + $0x49] sm:$0xff]  ;;  %v530_v11 = vld [vmem:[#allocation2 + $0x51] sm:$0xff] }
  0xbb   : > { %v1167_v60 = vmul.f32 %v1986_v54, %v2539_v35  ;;  %v1227_v58 = vadd.f32 %v2014_v8, %v1191_v40  ;;  %v810_v56 = vadd.f32 %v778_v62, %v713_v21  ;;  %v811_v48 = vadd.f32 %v779_v13, %v714_v18 }
  0xbc   : > { %v1168_v41 = vmul.f32 %v1986_v54, %v2547_v49  ;;  %v1228_v0 = vadd.f32 %v2014_v8, %v1192_v59  ;;  %v400_v15 = vmul.f32 %v1883_v5, %v367_v22  ;;  %v401_v44 = vmul.f32 %v1883_v5, %v368_v45 }
  0xbd   : > { %v465_v34 = vmul.f32 %v1886_v6, %v432_v52  ;;  %v1259_v53 = vmax.f32 %v1227_v58, 0.0  ;;  %v907_v35 = vadd.f32 %v875_v7, %v810_v56  ;;  %v908_v37 = vadd.f32 %v876_v61, %v811_v48 }
  0xbe   : > { %v466_v40 = vmul.f32 %v1886_v6, %v433_v31  ;;  %v1260_v62 = vmax.f32 %v1228_v0, 0.0  ;;  %v562_v21 = vmul.f32 %v1905_v14, %v529_v55  ;;  %v563_v54 = vmul.f32 %v1905_v14, %v530_v11  ;;  %v3099_v55 = vld [vmem:[#allocation7_spill] sm:$0xff] }
  0xbf   : > { %v497_v13 = vadd.f32 %v465_v34, %v400_v15  ;;  %v1005_v18 = vadd.f32 %v973_v12, %v907_v35  ;;  %v1006_v49 = vadd.f32 %v974_v17, %v908_v37  ;;  %v659_v22 = vmul.f32 %v2375_v36, %v1921_v25  ;;  %v3097_v35 = vld [vmem:[#allocation6_spill] sm:$0xff]  ;;  %v2590_v15 = vld [vmem:[%s2949_s1 + $0x8] ss:$0 sm:$0xff] }
  0xc0   : > { %v498_v59 = vadd.f32 %v466_v40, %v401_v44  ;;  %v1282_v45 = vpack.c.bf16 %v1260_v62, %v1259_v53  ;;  %v660_v7 = vmul.f32 %v2377_v42, %v1921_v25  ;;  %v756_v31 = vmul.f32 %v2381_v43, %v1924_v26  ;;  %v3101_v40 = vld [vmem:[#allocation10_spill] sm:$0xff] }
  0xc1   : > { %v594_v33 = vadd.f32 %v562_v21, %v497_v13  ;;  %v1102_v61 = vadd.f32 %v1070_v10, %v1005_v18  ;;  %v1103_v34 = vadd.f32 %v1071_v50, %v1006_v49  ;;  %v757_v58 = vmul.f32 %v2383_v2, %v1924_v26  ;;  %v3098_v10 = vld [vmem:[#allocation8_spill] sm:$0xff]  ;;  %v3102_v21 = vld [vmem:[#allocation11_spill] sm:$0xff] }
  0xc2   : > { %v595_v52 = vadd.f32 %v563_v54, %v498_v59  ;;  %1410 = vmatmul.bf16.gmra.mxu2 %v1282_v45  ;;  %v853_v44 = vmul.f32 %v2389_v4, %v1932_v29  ;;  %v854_v53 = vmul.f32 %v2391_v28, %v1932_v29  ;;  %v951_v12 = vmul.f32 %v1951_v38, %v3097_v35  ;;  %v3103_v35 = vld [vmem:[#allocation40_spill] sm:$0xff] }
  0xc3   : > { %v691_v37 = vadd.f32 %v659_v22, %v594_v33  ;;  %v1199_v17 = vadd.f32 %v1167_v60, %v1102_v61  ;;  %v1200_v56 = vadd.f32 %v1168_v41, %v1103_v34  ;;  %v952_v49 = vmul.f32 %v1951_v38, %v3098_v10  ;;  %v3100_v33 = vld [vmem:[#allocation9_spill] sm:$0xff] }
  0xc4   : > { %v692_v48 = vadd.f32 %v660_v7, %v595_v52  ;;  %v1048_v11 = vmul.f32 %v1971_v47, %v3099_v55  ;;  %v1049_v0 = vmul.f32 %v1971_v47, %v3100_v33  ;;  %v1145_v60 = vmul.f32 %v2590_v15, %v3101_v40 }
  0xc5   : > { %v788_v50 = vadd.f32 %v756_v31, %v691_v37  ;;  %v1235_v41 = vadd.f32 %v2014_v8, %v1199_v17  ;;  %v1236_v62 = vadd.f32 %v2014_v8, %v1200_v56  ;;  %v1146_v54 = vmul.f32 %v2590_v15, %v3102_v21 }
  0xc6   : > { %v789_v13 = vadd.f32 %v757_v58, %v692_v48  ;;  %v408_v59 = vmul.f32 %v2153_v19, %v1883_v5  ;;  %v409_v22 = vmul.f32 %v2161_v24, %v1883_v5  ;;  %v473_v45 = vmul.f32 %v2155_v20, %v1886_v6 }
  0xc7   : > { %v885_v18 = vadd.f32 %v853_v44, %v788_v50  ;;  %v1267_v7 = vmax.f32 %v1235_v41, 0.0  ;;  %v1268_v31 = vmax.f32 %v1236_v62, 0.0  ;;  %v474_v8 = vmul.f32 %v2165_v1, %v1886_v6  ;;  %v3105_v1 = vld [vmem:[#allocation42_spill] sm:$0xff]  ;;  %v3106_v50 = vld [vmem:[#allocation43_spill] sm:$0xff]  ;;  %v3109_v62 = vld [vmem:[#allocation13_spill] sm:$0xff] }
  0xc8   : > { %v886_v61 = vadd.f32 %v854_v53, %v789_v13  ;;  %v505_v52 = vadd.f32 %v473_v45, %v408_v59  ;;  %v570_v58 = vmul.f32 %v2171_v30, %v1905_v14  ;;  %v571_v19 = vmul.f32 %v3072_v27, %v1905_v14  ;;  %v3104_v53 = vld [vmem:[#allocation41_spill] sm:$0xff]  ;;  %v3110_v59 = vld [vmem:[#allocation15_spill] sm:$0xff] }
  0xc9   : > { %v983_v34 = vadd.f32 %v951_v12, %v885_v18  ;;  %v1286_v37 = vpack.c.bf16 %v1268_v31, %v1267_v7  ;;  %v506_v24 = vadd.f32 %v474_v8, %v409_v22  ;;  %v667_v20 = vmul.f32 %v3103_v35, %v1921_v25  ;;  %v3111_v22 = vld [vmem:[#allocation14_spill] sm:$0xff] }
  0xca   : > { %v984_v44 = vadd.f32 %v952_v49, %v886_v61  ;;  %v602_v56 = vadd.f32 %v570_v58, %v505_v52  ;;  %v668_v48 = vmul.f32 %v3104_v53, %v1921_v25  ;;  %v764_v12 = vmul.f32 %v3105_v1, %v1924_v26  ;;  %v3107_v49 = vld [vmem:[#allocation44_spill] sm:$0xff]  ;;  %v2631_v7 = vld [vmem:[%s2950_s2] ss:$0 sm:$0xff] }
  0xcb   : > { %v1080_v17 = vadd.f32 %v1048_v11, %v983_v34  ;;  %1430 = vmatmul.bf16.gmra.mxu3 %v1286_v37  ;;  %v603_v30 = vadd.f32 %v571_v19, %v506_v24  ;;  %v765_v27 = vmul.f32 %v3106_v50, %v1924_v26  ;;  %v861_v55 = vmul.f32 %v3107_v49, %v1932_v29  ;;  %v3108_v11 = vld [vmem:[#allocation12_spill] sm:$0xff]  ;;  %v3113_v34 = vld [vmem:[#allocation17_spill] sm:$0xff]  ;;  %v3114_v19 = vld [vmem:[#allocation18_spill] sm:$0xff] }
  0xcc   : > { %v1081_v10 = vadd.f32 %v1049_v0, %v984_v44  ;;  %v699_v40 = vadd.f32 %v667_v20, %v602_v56  ;;  %v862_v41 = vmul.f32 %v3108_v11, %v1932_v29  ;;  %v959_v13 = vmul.f32 %v1951_v38, %v3109_v62  ;;  %v3112_v61 = vld [vmem:[#allocation16_spill] sm:$0xff] }
  0xcd   : > { %v1177_v33 = vadd.f32 %v1145_v60, %v1080_v17  ;;  %v700_v18 = vadd.f32 %v668_v48, %v603_v30  ;;  %v960_v0 = vmul.f32 %v1951_v38, %v3110_v59  ;;  %v1056_v45 = vmul.f32 %v1971_v47, %v3111_v22  ;;  %v3115_v30 = vld [vmem:[#allocation28_spill] sm:$0xff] }
  0xce   : > { %v1178_v21 = vadd.f32 %v1146_v54, %v1081_v10  ;;  %v796_v31 = vadd.f32 %v764_v12, %v699_v40  ;;  %v1057_v8 = vmul.f32 %v1971_v47, %v3112_v61  ;;  %v1153_v54 = vmul.f32 %v2590_v15, %v3113_v34 }
  0xcf   : > { %v1213_v60 = vadd.f32 %v2631_v7, %v1177_v33  ;;  %v797_v58 = vadd.f32 %v765_v27, %v700_v18  ;;  %v1154_v37 = vmul.f32 %v2590_v15, %v3114_v19  ;;  %v416_v44 = vmul.f32 %v3080_v63, %v1883_v5  ;;  %v3116_v63 = vld [vmem:[#allocation29_spill] sm:$0xff] }
  0xd0   : > { %v1214_v52 = vadd.f32 %v2631_v7, %v1178_v21  ;;  %v893_v20 = vadd.f32 %v861_v55, %v796_v31  ;;  %v417_v17 = vmul.f32 %v2247_v51, %v1883_v5  ;;  %v481_v56 = vmul.f32 %v3084_v46, %v1886_v6  ;;  %v3117_v55 = vld [vmem:[#allocation19_spill] sm:$0xff]  ;;  %v3118_v46 = vld [vmem:[#allocation21_spill] sm:$0xff] }
  0xd1   : > { %v1245_v24 = vmax.f32 %v1213_v60, 0.0  ;;  %v894_v12 = vadd.f32 %v862_v41, %v797_v58  ;;  %v482_v10 = vmul.f32 %v3085_v3, %v1886_v6  ;;  %v578_v27 = vmul.f32 %v3115_v30, %v1905_v14  ;;  %v3119_v3 = vld [vmem:[#allocation20_spill] sm:$0xff] }
  0xd2   : > { %v1246_v48 = vmax.f32 %v1214_v52, 0.0  ;;  %v991_v33 = vadd.f32 %v959_v13, %v893_v20  ;;  %v513_v40 = vadd.f32 %v481_v56, %v416_v44  ;;  %v579_v62 = vmul.f32 %v3116_v63, %v1905_v14  ;;  %v3122_v20 = vld [vmem:[#allocation31_spill] sm:$0xff] }
  0xd3   : > { %v675_v21 = vmul.f32 %v3117_v55, %v1921_v25  ;;  %v992_v18 = vadd.f32 %v960_v0, %v894_v12  ;;  %v514_v59 = vadd.f32 %v482_v10, %v417_v17  ;;  %v676_v41 = vmul.f32 %v3118_v46, %v1921_v25  ;;  %v3120_v0 = vld [vmem:[#allocation22_spill] sm:$0xff]  ;;  %v3123_v12 = vld [vmem:[#allocation32_spill] sm:$0xff]  ;;  %v3124_v10 = vld [vmem:[#allocation33_spill] sm:$0xff] }
  0xd4   : > { %v1275_v51 = vpack.c.bf16 %v1246_v48, %v1245_v24  ;;  %v1088_v22 = vadd.f32 %v1056_v45, %v991_v33  ;;  %v610_v60 = vadd.f32 %v578_v27, %v513_v40  ;;  %v772_v31 = vmul.f32 %v3119_v3, %v1924_v26  ;;  %v3121_v24 = vld [vmem:[#allocation30_spill] sm:$0xff]  ;;  %v3126_v63 = vld [vmem:[#allocation35_spill] sm:$0xff] }
  0xd5   : > { %v773_v13 = vmul.f32 %v2485_v39, %v1924_v26  ;;  %v1089_v61 = vadd.f32 %v1057_v8, %v992_v18  ;;  %v611_v34 = vadd.f32 %v579_v62, %v514_v59  ;;  %v869_v52 = vmul.f32 %v2489_v23, %v1932_v29  ;;  %v3125_v40 = vld [vmem:[#allocation34_spill] sm:$0xff] }
  0xd6   : > { %1375 = vmatmul.bf16.gmra.mxu0 %v1275_v51  ;;  %v870_v58 = vmul.f32 %v3120_v0, %v1932_v29  ;;  %v1185_v19 = vadd.f32 %v1153_v54, %v1088_v22  ;;  %v707_v44 = vadd.f32 %v675_v21, %v610_v60  ;;  %v967_v45 = vmul.f32 %v1951_v38, %v3121_v24 }
  0xd7   : > { %v968_v17 = vmul.f32 %v1951_v38, %v3122_v20  ;;  %v1186_v56 = vadd.f32 %v1154_v37, %v1089_v61  ;;  %v708_v48 = vadd.f32 %v676_v41, %v611_v34  ;;  %v1064_v8 = vmul.f32 %v1971_v47, %v3123_v12  ;;  %v3127_v34 = vld [vmem:[#allocation38_spill] sm:$0xff] }
  0xd8   : > { %v1065_v30 = vmul.f32 %v1971_v47, %v3124_v10  ;;  %v1221_v27 = vadd.f32 %v2631_v7, %v1185_v19  ;;  %v804_v33 = vadd.f32 %v772_v31, %v707_v44  ;;  %v1161_v54 = vmul.f32 %v2590_v15, %v3125_v40 }
  0xd9   : > { %v1162_v62 = vmul.f32 %v2590_v15, %v3126_v63  ;;  %v1222_v21 = vadd.f32 %v2631_v7, %v1186_v56  ;;  %v805_v51 = vadd.f32 %v773_v13, %v708_v48  ;;  %v424_v37 = vmul.f32 %v2325_v32, %v1883_v5  ;;  %v3128_v13 = vld [vmem:[#allocation39_spill] sm:$0xff]  ;;  %v3133_v63 = vld [vmem:[#allocation26_spill] sm:$0xff] }
  0xda   : > { %v425_v18 = vmul.f32 %v2331_v9, %v1883_v5  ;;  %v1253_v59 = vmax.f32 %v1221_v27, 0.0  ;;  %v901_v41 = vadd.f32 %v869_v52, %v804_v33  ;;  %v489_v22 = vmul.f32 %v2333_v16, %v1886_v6  ;;  %v3129_v9 = vld [vmem:[#allocation23_spill] sm:$0xff] }
  0xdb   : > { %v490_v60 = vmul.f32 %v2341_v57, %v1886_v6  ;;  %v1254_v31 = vmax.f32 %v1222_v21, 0.0  ;;  %v902_v61 = vadd.f32 %v870_v58, %v805_v51  ;;  %v586_v19 = vmul.f32 %v3127_v34, %v1905_v14  ;;  %v2693_v56 = vld [vmem:[#allocation2 + $0x207] sm:$0xff]  ;;  %v3130_v57 = vld [vmem:[#allocation24_spill] sm:$0xff]  ;;  %v3131_v58 = vld [vmem:[#allocation25_spill] sm:$0xff] }
  0xdc   : > { %v587_v44 = vmul.f32 %v3128_v13, %v1905_v14  ;;  %v999_v32 = vadd.f32 %v967_v45, %v901_v41  ;;  %v521_v24 = vadd.f32 %v489_v22, %v424_v37  ;;  %v683_v52 = vmul.f32 %v3129_v9, %v1921_v25  ;;  %v2699_v27 = vld [vmem:[#allocation2 + $0x20f] sm:$0xff] }
  0xdd   : > { %v522_v20 = vadd.f32 %v490_v60, %v425_v18  ;;  %v1279_v16 = vpack.c.bf16 %v1254_v31, %v1253_v59  ;;  %v1000_v48 = vadd.f32 %v968_v17, %v902_v61  ;;  %v684_v12 = vmul.f32 %v3130_v57, %v1921_v25  ;;  %3132 = vst [vmem:[#allocation37_spill] sm:$0xff] %v2699_v27  ;;  %v2703_v51 = vld [vmem:[#allocation2 + $0x208] sm:$0xff]  ;;  %v2705_v37 = vld [vmem:[#allocation2 + $0x210] sm:$0xff] }
  0xde   : > { %v780_v10 = vmul.f32 %v3131_v58, %v1924_v26  ;;  %v1096_v33 = vadd.f32 %v1064_v8, %v999_v32  ;;  %v618_v40 = vadd.f32 %v586_v19, %v521_v24  ;;  %v781_v21 = vmul.f32 %v3133_v63, %v1924_v26  ;;  %3134 = vst [vmem:[#allocation6_spill] sm:$0xff] %v2703_v51  ;;  %v2707_v18 = vld [vmem:[#allocation2 + $0x209] sm:$0xff]  ;;  %v2715_v31 = vld [vmem:[#allocation2 + $0x211] sm:$0xff] }
  0xdf   : > { %v619_v45 = vadd.f32 %v587_v44, %v522_v20  ;;  %3135 = vst [vmem:[#allocation8_spill] sm:$0xff] %v2705_v37  ;;  %1395 = vmatmul.bf16.gmra.mxu1 %v1279_v16  ;;  %v1097_v17 = vadd.f32 %v1065_v30, %v1000_v48  ;;  %v3137_v59 = vld [vmem:[#allocation27_spill] sm:$0xff]  ;;  %v3138_v22 = vld [vmem:[#allocation36_spill] sm:$0xff]  ;;  %v975_v8 = vmul.f32 %v1951_v38, %v2693_v56 }
  0xe0   : > { %3136 = vst [vmem:[#allocation7_spill] sm:$0xff] %v2707_v18  ;;  %v877_v41 = vmul.f32 %v3137_v59, %v1932_v29  ;;  %v878_v60 = vmul.f32 %v3138_v22, %v1932_v29  ;;  %v1193_v61 = vadd.f32 %v1161_v54, %v1096_v33  ;;  %v715_v34 = vadd.f32 %v683_v52, %v618_v40  ;;  %v628_v40 = vld [vmem:[#allocation2 + $0x87] sm:$0xff] }
  0xe1   : > { %3139 = vst [vmem:[#allocation9_spill] sm:$0xff] %v2715_v31  ;;  %v716_v19 = vadd.f32 %v684_v12, %v619_v45  ;;  %v976_v13 = vmul.f32 %v1951_v38, %v2699_v27  ;;  %v1194_v44 = vadd.f32 %v1162_v62, %v1097_v17  ;;  %v1072_v30 = vmul.f32 %v1971_v47, %v2703_v51 }
  0xe2   : > { %v1073_v32 = vmul.f32 %v1971_v47, %v2705_v37  ;;  %v1169_v24 = vmul.f32 %v2590_v15, %v2707_v18  ;;  %v1229_v20 = vadd.f32 %v2631_v7, %v1193_v61  ;;  %v812_v16 = vadd.f32 %v780_v10, %v715_v34  ;;  %v725_v34 = vld [vmem:[#allocation2 + $0x88] sm:$0xff] }
  0xe3   : > { %v813_v48 = vadd.f32 %v781_v21, %v716_v19  ;;  %v1170_v54 = vmul.f32 %v2590_v15, %v2715_v31  ;;  %v1230_v52 = vadd.f32 %v2631_v7, %v1194_v44  ;;  %v402_v62 = vmul.f32 %v2375_v36, %v1883_v5  ;;  %v629_v21 = vld [vmem:[#allocation2 + $0x8f] sm:$0xff] }
  0xe4   : > { %v403_v12 = vmul.f32 %v2377_v42, %v1883_v5  ;;  %v467_v33 = vmul.f32 %v2381_v43, %v1886_v6  ;;  %v1261_v45 = vmax.f32 %v1229_v20, 0.0  ;;  %v909_v17 = vadd.f32 %v877_v41, %v812_v16  ;;  %v726_v31 = vld [vmem:[#allocation2 + $0x90] sm:$0xff]  ;;  %v920_v16 = vld [vmem:[#allocation2 + $0xa7] sm:$0xff] }
  0xe5   : > { %v910_v61 = vadd.f32 %v878_v60, %v813_v48  ;;  %v468_v10 = vmul.f32 %v2383_v2, %v1886_v6  ;;  %v1262_v19 = vmax.f32 %v1230_v52, 0.0  ;;  %v564_v36 = vmul.f32 %v2389_v4, %v1905_v14  ;;  %v822_v60 = vld [vmem:[#allocation2 + $0x89] sm:$0xff]  ;;  %v823_v20 = vld [vmem:[#allocation2 + $0x91] sm:$0xff] }
  0xe6   : > { %v499_v44 = vadd.f32 %v467_v33, %v402_v62  ;;  %v565_v42 = vmul.f32 %v2391_v28, %v1905_v14  ;;  %v1007_v18 = vadd.f32 %v975_v8, %v909_v17  ;;  %v661_v41 = vmul.f32 %v1921_v25, %v628_v40  ;;  %v921_v33 = vld [vmem:[#allocation2 + $0xaf] sm:$0xff] }
  0xe7   : > { %v1008_v43 = vadd.f32 %v976_v13, %v910_v61  ;;  %v500_v37 = vadd.f32 %v468_v10, %v403_v12  ;;  %v1283_v2 = vpack.c.bf16 %v1262_v19, %v1261_v45  ;;  %v662_v52 = vmul.f32 %v1921_v25, %v629_v21  ;;  %v1017_v8 = vld [vmem:[#allocation2 + $0xa8] sm:$0xff]  ;;  %v1018_v13 = vld [vmem:[#allocation2 + $0xb0] sm:$0xff] }
  0xe8   : > { %v596_v48 = vadd.f32 %v564_v36, %v499_v44  ;;  %v758_v62 = vmul.f32 %v1924_v26, %v725_v34  ;;  %v1104_v4 = vadd.f32 %v1072_v30, %v1007_v18  ;;  %v759_v28 = vmul.f32 %v1924_v26, %v726_v31  ;;  %v1114_v12 = vld [vmem:[#allocation2 + $0xa9] sm:$0xff]  ;;  %v1115_v10 = vld [vmem:[#allocation2 + $0xb1] sm:$0xff] }
  0xe9   : > { %v1105_v51 = vadd.f32 %v1073_v32, %v1008_v43  ;;  %v597_v27 = vadd.f32 %v565_v42, %v500_v37  ;;  %1415 = vmatmul.bf16.gmra.mxu2 %v1283_v2  ;;  %v855_v17 = vmul.f32 %v1932_v29, %v822_v60  ;;  %v856_v45 = vmul.f32 %v1932_v29, %v823_v20 }
  0xea   : > { %v693_v40 = vadd.f32 %v661_v41, %v596_v48  ;;  %v953_v61 = vmul.f32 %v1951_v38, %v920_v16  ;;  %v1201_v21 = vadd.f32 %v1169_v24, %v1104_v4  ;;  %v954_v18 = vmul.f32 %v1951_v38, %v921_v33  ;;  %v637_v48 = vld [vmem:[#allocation2 + $0x10f] sm:$0xff] }
  0xeb   : > { %v1202_v34 = vadd.f32 %v1170_v54, %v1105_v51  ;;  %v694_v19 = vadd.f32 %v662_v52, %v597_v27  ;;  %v1050_v31 = vmul.f32 %v1971_v47, %v1017_v8  ;;  %v1051_v30 = vmul.f32 %v1971_v47, %v1018_v13  ;;  %v636_v54 = vld [vmem:[#allocation2 + $0x107] sm:$0xff]  ;;  %v734_v4 = vld [vmem:[#allocation2 + $0x110] sm:$0xff] }
  0xec   : > { %v790_v37 = vadd.f32 %v758_v62, %v693_v40  ;;  %v1147_v32 = vmul.f32 %v2590_v15, %v1114_v12  ;;  %v1237_v44 = vadd.f32 %v2631_v7, %v1201_v21  ;;  %v1148_v43 = vmul.f32 %v2590_v15, %v1115_v10  ;;  %v733_v52 = vld [vmem:[#allocation2 + $0x108] sm:$0xff]  ;;  %v831_v40 = vld [vmem:[#allocation2 + $0x111] sm:$0xff] }
  0xed   : > { %v1238_v36 = vadd.f32 %v2631_v7, %v1202_v34  ;;  %v791_v42 = vadd.f32 %v759_v28, %v694_v19  ;;  %v410_v27 = vmul.f32 %v3103_v35, %v1883_v5  ;;  %v411_v51 = vmul.f32 %v3104_v53, %v1883_v5  ;;  %v830_v28 = vld [vmem:[#allocation2 + $0x109] sm:$0xff] }
  0xee   : > { %v887_v41 = vadd.f32 %v855_v17, %v790_v37  ;;  %v475_v24 = vmul.f32 %v3105_v1, %v1886_v6  ;;  %v1269_v60 = vmax.f32 %v1237_v44, 0.0  ;;  %v476_v2 = vmul.f32 %v3106_v50, %v1886_v6  ;;  %v928_v17 = vld [vmem:[#allocation2 + $0x127] sm:$0xff]  ;;  %v929_v21 = vld [vmem:[#allocation2 + $0x12f] sm:$0xff] }
  0xef   : > { %v1270_v20 = vmax.f32 %v1238_v36, 0.0  ;;  %v888_v16 = vadd.f32 %v856_v45, %v791_v42  ;;  %v572_v35 = vmul.f32 %v3107_v49, %v1905_v14  ;;  %v573_v53 = vmul.f32 %v3108_v11, %v1905_v14  ;;  %v1025_v49 = vld [vmem:[#allocation2 + $0x128] sm:$0xff]  ;;  %v1026_v37 = vld [vmem:[#allocation2 + $0x130] sm:$0xff] }
  0xf0   : > { %v985_v62 = vadd.f32 %v953_v61, %v887_v41  ;;  %v507_v33 = vadd.f32 %v475_v24, %v410_v27  ;;  %v508_v13 = vadd.f32 %v476_v2, %v411_v51  ;;  %v669_v12 = vmul.f32 %v1921_v25, %v636_v54  ;;  %v1122_v44 = vld [vmem:[#allocation2 + $0x129] sm:$0xff]  ;;  %v1123_v27 = vld [vmem:[#allocation2 + $0x131] sm:$0xff] }
  0xf1   : > { %v1287_v1 = vpack.c.bf16 %v1270_v20, %v1269_v60  ;;  %v986_v8 = vadd.f32 %v954_v18, %v888_v16  ;;  %v670_v61 = vmul.f32 %v1921_v25, %v637_v48  ;;  %v766_v10 = vmul.f32 %v1924_v26, %v733_v52 }
  0xf2   : > { %v1082_v50 = vadd.f32 %v1050_v31, %v985_v62  ;;  %v604_v45 = vadd.f32 %v572_v35, %v507_v33  ;;  %v605_v11 = vadd.f32 %v573_v53, %v508_v13  ;;  %v767_v19 = vmul.f32 %v1924_v26, %v734_v4  ;;  %v644_v62 = vld [vmem:[#allocation2 + $0x187] sm:$0xff] }
  0xf3   : > { %1435 = vmatmul.bf16.gmra.mxu3 %v1287_v1  ;;  %v1083_v34 = vadd.f32 %v1051_v30, %v986_v8  ;;  %v863_v18 = vmul.f32 %v1932_v29, %v830_v28  ;;  %v864_v31 = vmul.f32 %v1932_v29, %v831_v40  ;;  %v961_v41 = vmul.f32 %v1951_v38, %v928_v17  ;;  %v645_v28 = vld [vmem:[#allocation2 + $0x18f] sm:$0xff] }
  0xf4   : > { %v1179_v36 = vadd.f32 %v1147_v32, %v1082_v50  ;;  %v701_v42 = vadd.f32 %v669_v12, %v604_v45  ;;  %v702_v24 = vadd.f32 %v670_v61, %v605_v11  ;;  %v962_v54 = vmul.f32 %v1951_v38, %v929_v21  ;;  %v741_v40 = vld [vmem:[#allocation2 + $0x188] sm:$0xff] }
  0xf5   : > { %v1180_v51 = vadd.f32 %v1148_v43, %v1083_v34  ;;  %v1058_v30 = vmul.f32 %v1971_v47, %v1025_v49  ;;  %v1059_v16 = vmul.f32 %v1971_v47, %v1026_v37  ;;  %v1155_v2 = vmul.f32 %v2590_v15, %v1122_v44  ;;  %v838_v61 = vld [vmem:[#allocation2 + $0x189] sm:$0xff] }
  0xf6   : > { %v1215_v60 = vadd.f32 %v2631_v7, %v1179_v36  ;;  %v798_v20 = vadd.f32 %v766_v10, %v701_v42  ;;  %v799_v48 = vadd.f32 %v767_v19, %v702_v24  ;;  %v1156_v52 = vmul.f32 %v2590_v15, %v1123_v27  ;;  %v937_v11 = vld [vmem:[#allocation2 + $0x1af] sm:$0xff] }
  0xf7   : > { %v1216_v32 = vadd.f32 %v2631_v7, %v1180_v51  ;;  %v418_v43 = vmul.f32 %v3117_v55, %v1883_v5  ;;  %v419_v53 = vmul.f32 %v3118_v46, %v1883_v5  ;;  %v483_v4 = vmul.f32 %v3119_v3, %v1886_v6  ;;  %v742_v55 = vld [vmem:[#allocation2 + $0x190] sm:$0xff]  ;;  %v1033_v44 = vld [vmem:[#allocation2 + $0x1a8] sm:$0xff] }
  0xf8   : > { %v1247_v33 = vmax.f32 %v1215_v60, 0.0  ;;  %v895_v35 = vadd.f32 %v863_v18, %v798_v20  ;;  %v896_v8 = vadd.f32 %v864_v31, %v799_v48  ;;  %v484_v13 = vmul.f32 %v2485_v39, %v1886_v6  ;;  %v839_v3 = vld [vmem:[#allocation2 + $0x191] sm:$0xff]  ;;  %v936_v39 = vld [vmem:[#allocation2 + $0x1a7] sm:$0xff]  ;;  %v1366_v20 = vpop.f32.mrf.mxu0 }
  0xf9   : > { %v1248_v1 = vmax.f32 %v1216_v32, 0.0  ;;  %v580_v12 = vmul.f32 %v2489_v23, %v1905_v14  ;;  %v515_v50 = vadd.f32 %v483_v4, %v418_v43  ;;  %v581_v45 = vmul.f32 %v3120_v0, %v1905_v14  ;;  %v1034_v36 = vld [vmem:[#allocation2 + $0x1b0] sm:$0xff] }
  0xfa   : > { %v993_v17 = vadd.f32 %v961_v41, %v895_v35  ;;  %v677_v46 = vmul.f32 %v1921_v25, %v644_v62  ;;  %v994_v21 = vadd.f32 %v962_v54, %v896_v8  ;;  %v516_v49 = vadd.f32 %v484_v13, %v419_v53  ;;  %v1130_v27 = vld [vmem:[#allocation2 + $0x1a9] sm:$0xff]  ;;  %v1131_v51 = vld [vmem:[#allocation2 + $0x1b1] sm:$0xff] }
  0xfb   : > { %v1276_v10 = vpack.c.bf16 %v1248_v1, %v1247_v33  ;;  %v678_v34 = vmul.f32 %v1921_v25, %v645_v28  ;;  %v612_v23 = vadd.f32 %v580_v12, %v515_v50  ;;  %v774_v18 = vmul.f32 %v1924_v26, %v741_v40 }
  0xfc   : > { %v1090_v19 = vadd.f32 %v1058_v30, %v993_v17  ;;  %v775_v37 = vmul.f32 %v1924_v26, %v742_v55  ;;  %v1091_v0 = vadd.f32 %v1059_v16, %v994_v21  ;;  %v613_v42 = vadd.f32 %v581_v45, %v516_v49  ;;  %v944_v49 = vld [vmem:[#allocation2 + $0x227] sm:$0xff] }
  0xfd   : > { %1380 = vmatmul.bf16.gmra.mxu0 %v1276_v10  ;;  %v871_v31 = vmul.f32 %v1932_v29, %v838_v61  ;;  %v872_v41 = vmul.f32 %v1932_v29, %v839_v3  ;;  %v709_v54 = vadd.f32 %v677_v46, %v612_v23  ;;  %v969_v30 = vmul.f32 %v1951_v38, %v936_v39  ;;  %v3143_v39 = vld [vmem:[#allocation7_spill] sm:$0xff] }
  0xfe   : > { %v1187_v24 = vadd.f32 %v1155_v2, %v1090_v19  ;;  %v970_v60 = vmul.f32 %v1951_v38, %v937_v11  ;;  %v1188_v32 = vadd.f32 %v1156_v52, %v1091_v0  ;;  %v710_v48 = vadd.f32 %v678_v34, %v613_v42  ;;  %v945_v34 = vld [vmem:[#allocation2 + $0x22f] sm:$0xff] }
  0xff   : > { %v1066_v43 = vmul.f32 %v1971_v47, %v1033_v44  ;;  %v1067_v16 = vmul.f32 %v1971_v47, %v1034_v36  ;;  %v806_v33 = vadd.f32 %v774_v18, %v709_v54  ;;  %v1163_v35 = vmul.f32 %v2590_v15, %v1130_v27  ;;  %v1713_v54 = vld [vmem:[#allocation2] sm:$0xff] }
 0x100   : > { %v1223_v62 = vadd.f32 %v2631_v7, %v1187_v24  ;;  %v1164_v53 = vmul.f32 %v2590_v15, %v1131_v51  ;;  %v1224_v2 = vadd.f32 %v2631_v7, %v1188_v32  ;;  %v807_v4 = vadd.f32 %v775_v37, %v710_v48  ;;  %v3144_v37 = vld [vmem:[#allocation9_spill] sm:$0xff] }
 0x101   : > { %v426_v28 = vmul.f32 %v3129_v9, %v1883_v5  ;;  %v427_v52 = vmul.f32 %v3130_v57, %v1883_v5  ;;  %v903_v8 = vadd.f32 %v871_v31, %v806_v33  ;;  %v491_v13 = vmul.f32 %v3131_v58, %v1886_v6  ;;  %v3140_v58 = vld [vmem:[#allocation37_spill] sm:$0xff] }
 0x102   : > { %v1255_v1 = vmax.f32 %v1223_v62, 0.0  ;;  %v492_v12 = vmul.f32 %v3133_v63, %v1886_v6  ;;  %v1256_v40 = vmax.f32 %v1224_v2, 0.0  ;;  %v904_v55 = vadd.f32 %v872_v41, %v807_v4  ;;  %v3141_v6 = vld [vmem:[#allocation6_spill] sm:$0xff] }
 0x103   : > { %v588_v17 = vmul.f32 %v3137_v59, %v1905_v14  ;;  %v589_v9 = vmul.f32 %v3138_v22, %v1905_v14  ;;  %v1001_v50 = vadd.f32 %v969_v30, %v903_v8  ;;  %v523_v45 = vadd.f32 %v491_v13, %v426_v28  ;;  %v3142_v14 = vld [vmem:[#allocation8_spill] sm:$0xff] }
 0x104   : > { %v524_v5 = vadd.f32 %v492_v12, %v427_v52  ;;  %v685_v57 = vmul.f32 %v2693_v56, %v1921_v25  ;;  %v1280_v46 = vpack.c.bf16 %v1256_v40, %v1255_v1  ;;  %v1002_v61 = vadd.f32 %v970_v60, %v904_v55  ;;  %v2831_v56 = vld [vmem:[%s2952_s4] ss:$0 sm:$0xff]  ;;  %v1139_v60 = vld [vmem:[#allocation2 + $0x231] sm:$0xff] }
 0x105   : > { %v686_v3 = vmul.f32 %v3140_v58, %v1921_v25  ;;  %v782_v63 = vmul.f32 %v3141_v6, %v1924_v26  ;;  %v1098_v59 = vadd.f32 %v1066_v43, %v1001_v50  ;;  %v620_v10 = vadd.f32 %v588_v17, %v523_v45 }
 0x106   : > { %v621_v21 = vadd.f32 %v589_v9, %v524_v5  ;;  %v783_v22 = vmul.f32 %v3142_v14, %v1924_v26  ;;  %1400 = vmatmul.bf16.gmra.mxu1 %v1280_v46  ;;  %v1099_v25 = vadd.f32 %v1067_v16, %v1002_v61  ;;  %v879_v11 = vmul.f32 %v3143_v39, %v1932_v29  ;;  %v1368_v26 = vpop.f32.mrf.mxu0 }
 0x107   : > { %v1195_v19 = vadd.f32 %v1163_v35, %v1098_v59  ;;  %v717_v23 = vadd.f32 %v685_v57, %v620_v10  ;;  %v880_v44 = vmul.f32 %v3144_v37, %v1932_v29  ;;  %v977_v0 = vmul.f32 %v1951_v38, %v944_v49  ;;  %v1138_v29 = vld [vmem:[#allocation2 + $0x229] sm:$0xff] }
 0x108   : > { %v718_v18 = vadd.f32 %v686_v3, %v621_v21  ;;  %v1196_v36 = vadd.f32 %v1164_v53, %v1099_v25  ;;  %v978_v42 = vmul.f32 %v1951_v38, %v945_v34  ;;  %v1367_v51 = vadd.f32 %v2831_v56, %v1366_v20 }
 0x109   : > { %v1231_v31 = vadd.f32 %v2631_v7, %v1195_v19  ;;  %v814_v41 = vadd.f32 %v782_v63, %v717_v23  ;;  %v1074_v30 = vmul.f32 %v1713_v54, %v1971_v47  ;;  %v1369_v32 = vadd.f32 %v2831_v56, %v1368_v26 }
 0x10a   : > { %v815_v27 = vadd.f32 %v783_v22, %v718_v18  ;;  %v1232_v24 = vadd.f32 %v2631_v7, %v1196_v36  ;;  %v1446_v62 = vmax.f32 %v1367_v51, 0.0  ;;  %v1171_v2 = vmul.f32 %v2590_v15, %v1138_v29 }
 0x10b   : > { %v1263_v48 = vmax.f32 %v1231_v31, 0.0  ;;  %v911_v43 = vadd.f32 %v879_v11, %v814_v41  ;;  %v1447_v33 = vmax.f32 %v1369_v32, 0.0  ;;  %v1172_v20 = vmul.f32 %v2590_v15, %v1139_v60 }
 0x10c   : > { %v912_v16 = vadd.f32 %v880_v44, %v815_v27  ;;  %v1264_v38 = vmax.f32 %v1232_v24, 0.0  ;;  %1478 = vst [vmem:[%s2848_s8] sm:$0xff] %v1446_v62 }
 0x10d   : > { %v1009_v35 = vadd.f32 %v977_v0, %v911_v43  ;;  %1479 = vst [vmem:[%s2848_s8 + $0x8] sm:$0xff] %v1447_v33 }
 0x10e   : > { %v1010_v53 = vadd.f32 %v978_v42, %v912_v16  ;;  %v1284_v47 = vpack.c.bf16 %v1264_v38, %v1263_v48 }
 0x10f   : > { %v1106_v4 = vadd.f32 %v1074_v30, %v1009_v35 }
 0x110   : > { %v1107_v28 = vadd.f32 %v1074_v30, %v1010_v53  ;;  %1420 = vmatmul.bf16.gmra.mxu2 %v1284_v47 }
 0x111   : > { %v1203_v52 = vadd.f32 %v1171_v2, %v1106_v4 }
 0x112   : > { %v1204_v1 = vadd.f32 %v1172_v20, %v1107_v28 }
 0x113   : > { %v1239_v8 = vadd.f32 %v2631_v7, %v1203_v52 }
 0x114   : > { %v1240_v13 = vadd.f32 %v2631_v7, %v1204_v1  ;;  %v1386_v15 = vpop.f32.mrf.mxu1 }
 0x115   : > { %v1387_v12 = vadd.f32 %v2831_v56, %v1386_v15  ;;  %v1271_v40 = vmax.f32 %v1239_v8, 0.0 }
 0x116   : > { %v1272_v55 = vmax.f32 %v1240_v13, 0.0 }
 0x117   : > { %v1454_v17 = vmax.f32 %v1387_v12, 0.0 }
 0x118   : > { %v1288_v9 = vpack.c.bf16 %v1272_v55, %v1271_v40 }
 0x119   : > { %1486 = vst [vmem:[%s2848_s8 + $0x40] sm:$0xff] %v1454_v17 }
 0x11a   : > { %1440 = vmatmul.bf16.gmra.mxu3 %v1288_v9 }
 0x11c   : > { %v1388_v50 = vpop.f32.mrf.mxu1 }
 0x11d   : > { %v1389_v45 = vadd.f32 %v2831_v56, %v1388_v50 }
 0x11f   : > { %v1455_v5 = vmax.f32 %v1389_v45, 0.0 }
 0x121   : > { %v1406_v57 = vpop.f32.mrf.mxu2  ;;  %1487 = vst [vmem:[%s2848_s8 + $0x48] sm:$0xff] %v1455_v5 }
 0x122   : > { %v1407_v7 = vadd.f32 %v2831_v56, %v1406_v57 }
 0x124   : > { %v1462_v46 = vmax.f32 %v1407_v7, 0.0 }
 0x126   : > { %1494 = vst [vmem:[%s2848_s8 + $0x80] sm:$0xff] %v1462_v46 }
 0x129   : > { %v1408_v61 = vpop.f32.mrf.mxu2 }
 0x12a   : > { %v1426_v58 = vpop.f32.mrf.mxu3  ;;  %v1409_v3 = vadd.f32 %v2831_v56, %v1408_v61  ;;  %v1371_v63 = vpop.f32.mrf.mxu0 }
 0x12b   : > { %v1427_v6 = vadd.f32 %v2831_v56, %v1426_v58  ;;  %v1372_v21 = vadd.f32 %v2831_v56, %v1371_v63 }
 0x12c   : > { %v1463_v59 = vmax.f32 %v1409_v3, 0.0 }
 0x12d   : > { %v1470_v10 = vmax.f32 %v1427_v6, 0.0  ;;  %v1448_v14 = vmax.f32 %v1372_v21, 0.0 }
 0x12e   : > { %1495 = vst [vmem:[%s2848_s8 + $0x88] sm:$0xff] %v1463_v59 }
 0x12f   : > { %1502 = vst [vmem:[%s2848_s8 + $0xc0] sm:$0xff] %v1470_v10 }
 0x130   : > { %1480 = vst [vmem:[%s2848_s8 + $0x10] sm:$0xff] %v1448_v14 }
 0x132   : > { %v1428_v22 = vpop.f32.mrf.mxu3  ;;  %v1373_v34 = vpop.f32.mrf.mxu0 }
 0x133   : > { %v1429_v49 = vadd.f32 %v2831_v56, %v1428_v22  ;;  %v1374_v39 = vadd.f32 %v2831_v56, %v1373_v34 }
 0x135   : > { %v1471_v25 = vmax.f32 %v1429_v49, 0.0  ;;  %v1391_v11 = vpop.f32.mrf.mxu1  ;;  %v1449_v19 = vmax.f32 %v1374_v39, 0.0 }
 0x136   : > { %v1392_v23 = vadd.f32 %v2831_v56, %v1391_v11 }
 0x137   : > { %1503 = vst [vmem:[%s2848_s8 + $0xc8] sm:$0xff] %v1471_v25 }
 0x138   : > { %1481 = vst [vmem:[%s2848_s8 + $0x18] sm:$0xff] %v1449_v19  ;;  %v1456_v18 = vmax.f32 %v1392_v23, 0.0 }
 0x13a   : > { %1488 = vst [vmem:[%s2848_s8 + $0x50] sm:$0xff] %v1456_v18 }
 0x13d   : > { %v1393_v37 = vpop.f32.mrf.mxu1 }
 0x13e   : > { %v1394_v44 = vadd.f32 %v2831_v56, %v1393_v37 }
 0x140   : > { %v1457_v26 = vmax.f32 %v1394_v44, 0.0 }
 0x142   : > { %1489 = vst [vmem:[%s2848_s8 + $0x58] sm:$0xff] %v1457_v26 }
 0x145   : > { %v1411_v36 = vpop.f32.mrf.mxu2 }
 0x146   : > { %v1412_v0 = vadd.f32 %v2831_v56, %v1411_v36 }
 0x148   : > { %v1464_v42 = vmax.f32 %v1412_v0, 0.0 }
 0x14a   : > { %1496 = vst [vmem:[%s2848_s8 + $0x90] sm:$0xff] %v1464_v42 }
 0x14d   : > { %v1413_v31 = vpop.f32.mrf.mxu2 }
 0x14e   : > { %v1431_v41 = vpop.f32.mrf.mxu3  ;;  %v1414_v27 = vadd.f32 %v2831_v56, %v1413_v31 }
 0x14f   : > { %v1432_v51 = vadd.f32 %v2831_v56, %v1431_v41 }
 0x150   : > { %v1465_v24 = vmax.f32 %v1414_v27, 0.0 }
 0x151   : > { %v1472_v54 = vmax.f32 %v1432_v51, 0.0 }
 0x152   : > { %1497 = vst [vmem:[%s2848_s8 + $0x98] sm:$0xff] %v1465_v24 }
 0x153   : > { %v1376_v30 = vpop.f32.mrf.mxu0  ;;  %1504 = vst [vmem:[%s2848_s8 + $0xd0] sm:$0xff] %v1472_v54 }
 0x154   : > { %v1377_v29 = vadd.f32 %v2831_v56, %v1376_v30 }
 0x156   : > { %v1450_v60 = vmax.f32 %v1377_v29, 0.0  ;;  %v1433_v32 = vpop.f32.mrf.mxu3 }
 0x157   : > { %v1434_v48 = vadd.f32 %v2831_v56, %v1433_v32 }
 0x158   : > { %1482 = vst [vmem:[%s2848_s8 + $0x20] sm:$0xff] %v1450_v60 }
 0x159   : > { %v1473_v43 = vmax.f32 %v1434_v48, 0.0 }
 0x15b   : > { %v1378_v16 = vpop.f32.mrf.mxu0  ;;  %1505 = vst [vmem:[%s2848_s8 + $0xd8] sm:$0xff] %v1473_v43 }
 0x15c   : > { %v1379_v62 = vadd.f32 %v2831_v56, %v1378_v16  ;;  %v1396_v38 = vpop.f32.mrf.mxu1 }
 0x15d   : > { %v1397_v33 = vadd.f32 %v2831_v56, %v1396_v38 }
 0x15e   : > { %v1451_v35 = vmax.f32 %v1379_v62, 0.0 }
 0x15f   : > { %v1458_v53 = vmax.f32 %v1397_v33, 0.0 }
 0x160   : > { %1483 = vst [vmem:[%s2848_s8 + $0x28] sm:$0xff] %v1451_v35 }
 0x161   : > { %1490 = vst [vmem:[%s2848_s8 + $0x60] sm:$0xff] %v1458_v53 }
 0x164   : > { %v1398_v2 = vpop.f32.mrf.mxu1 }
 0x165   : > { %v1399_v20 = vadd.f32 %v2831_v56, %v1398_v2 }
 0x167   : > { %v1459_v47 = vmax.f32 %v1399_v20, 0.0 }
 0x169   : > { %1491 = vst [vmem:[%s2848_s8 + $0x68] sm:$0xff] %v1459_v47 }
 0x16c   : > { %v1416_v4 = vpop.f32.mrf.mxu2 }
 0x16d   : > { %v1417_v28 = vadd.f32 %v2831_v56, %v1416_v4 }
 0x16f   : > { %v1466_v52 = vmax.f32 %v1417_v28, 0.0 }
 0x171   : > { %1498 = vst [vmem:[%s2848_s8 + $0xa0] sm:$0xff] %v1466_v52 }
 0x174   : > { %v1418_v1 = vpop.f32.mrf.mxu2 }
 0x175   : > { %v1419_v13 = vadd.f32 %v2831_v56, %v1418_v1 }
 0x176   : > { %v1436_v8 = vpop.f32.mrf.mxu3 }
 0x177   : > { %v1437_v15 = vadd.f32 %v2831_v56, %v1436_v8  ;;  %v1467_v12 = vmax.f32 %v1419_v13, 0.0 }
 0x179   : > { %v1474_v40 = vmax.f32 %v1437_v15, 0.0  ;;  %1499 = vst [vmem:[%s2848_s8 + $0xa8] sm:$0xff] %v1467_v12 }
 0x17a   : > { %v1381_v55 = vpop.f32.mrf.mxu0 }
 0x17b   : > { %1506 = vst [vmem:[%s2848_s8 + $0xe0] sm:$0xff] %v1474_v40  ;;  %v1382_v17 = vadd.f32 %v2831_v56, %v1381_v55 }
 0x17d   : > { %v1452_v9 = vmax.f32 %v1382_v17, 0.0 }
 0x17e   : > { %v1438_v50 = vpop.f32.mrf.mxu3 }
 0x17f   : > { %1484 = vst [vmem:[%s2848_s8 + $0x30] sm:$0xff] %v1452_v9  ;;  %v1439_v45 = vadd.f32 %v2831_v56, %v1438_v50 }
 0x181   : > { %v1475_v5 = vmax.f32 %v1439_v45, 0.0 }
 0x182   : > { %v1383_v57 = vpop.f32.mrf.mxu0 }
 0x183   : > { %1507 = vst [vmem:[%s2848_s8 + $0xe8] sm:$0xff] %v1475_v5  ;;  %v1384_v7 = vadd.f32 %v2831_v56, %v1383_v57  ;;  %v1401_v46 = vpop.f32.mrf.mxu1 }
 0x184   : > { %v1402_v61 = vadd.f32 %v2831_v56, %v1401_v46 }
 0x185   : > { %v1453_v58 = vmax.f32 %v1384_v7, 0.0 }
 0x186   : > { %v1460_v3 = vmax.f32 %v1402_v61, 0.0 }
 0x187   : > { %1485 = vst [vmem:[%s2848_s8 + $0x38] sm:$0xff] %v1453_v58 }
 0x188   : > { %1492 = vst [vmem:[%s2848_s8 + $0x70] sm:$0xff] %v1460_v3 }
 0x18b   : > { %v1403_v6 = vpop.f32.mrf.mxu1 }
 0x18c   : > { %v1404_v63 = vadd.f32 %v2831_v56, %v1403_v6 }
 0x18e   : > { %v1461_v59 = vmax.f32 %v1404_v63, 0.0 }
 0x190   : > { %1493 = vst [vmem:[%s2848_s8 + $0x78] sm:$0xff] %v1461_v59 }
 0x193   : > { %v1421_v10 = vpop.f32.mrf.mxu2 }
 0x194   : > { %v1422_v21 = vadd.f32 %v2831_v56, %v1421_v10 }
 0x196   : > { %v1468_v14 = vmax.f32 %v1422_v21, 0.0 }
 0x198   : > { %1500 = vst [vmem:[%s2848_s8 + $0xb0] sm:$0xff] %v1468_v14 }
 0x19b   : > { %v1423_v22 = vpop.f32.mrf.mxu2 }
 0x19c   : > { %v1424_v34 = vadd.f32 %v2831_v56, %v1423_v22 }
 0x19d   : > { %v1441_v49 = vpop.f32.mrf.mxu3 }
 0x19e   : > { %v1442_v25 = vadd.f32 %v2831_v56, %v1441_v49  ;;  %v1469_v39 = vmax.f32 %v1424_v34, 0.0 }
 0x1a0   : > { %v1476_v11 = vmax.f32 %v1442_v25, 0.0  ;;  %1501 = vst [vmem:[%s2848_s8 + $0xb8] sm:$0xff] %v1469_v39 }
 0x1a2   : > { %1508 = vst [vmem:[%s2848_s8 + $0xf0] sm:$0xff] %v1476_v11 }
 0x1a5   : > { %v1443_v19 = vpop.f32.mrf.mxu3 }
 0x1a6   : > { %v1444_v23 = vadd.f32 %v2831_v56, %v1443_v19 }
 0x1a8   : > { %v1477_v18 = vmax.f32 %v1444_v23, 0.0 }
 0x1aa   : > { %1509 = vst [vmem:[%s2848_s8 + $0xf8] sm:$0xff] %v1477_v18 }
 0x1ab   : > { %1741 = shalt.err (!%p1738_p3)
}
 0x1ac   : > { %s1779_s26 = smov 128   ;;  %s1780_s7 = smov 8  }
 0x1ad   : > { %1666 = dma.vmem_to_hbm [thread:$0]  (%p1849_p5), %s1524_s13, 4096, %s1526_s14, %s1511_s22, %s1779_s26, %s1779_s26, %s1780_s7  }
 0x1ae PF: > { %p1672_p4 = scmp.ge.s32.totalorder %s1776_s21, 2  ;;  %s1540_s8 = sand.u32 1, %s1764_s18  }
 0x1af   : > { %s1541_s9 = scalar_lea.sflag [#allocation4], %s1540_s8 }
 0x1b0   : > { %p1669_p7 = pnand %p1672_p4, %p1853_p6 }
 0x1b2   : > { %p1670_p8 = pneg %p1669_p7 }
 0x1b4   : > { %1759 = dma.done.wait (%p1670_p8), %s1541_s9, 4096  }
 0x1b5   : > { %1761 = vsyncadd (%p1670_p8), %s1541_s9, 4294963200  ;;  %p15_p9 = scmp.ge.s32.totalorder %s1836_s24, 4   ;;  %s3145_s18 = smov %s1768_s19 }
 0x1b6   : > { %s3146_s19 = smov %s1772_s20  ;;  %s3147_s20 = smov %s1847_s27 }
 0x1b7   : > { %s3148_s21 = smov %s1836_s24  ;;  %17 = sbr.rel (!%p15_p9) target bundleno = 3 (0x3), region = 77 }
 0x1bc   :  { %1547 = vsyncpa [#allocation4], 1 }
 0x1bd   :  { %1549 = vsyncpa [#allocation4 + $0x1], 1 }

</bundles_post_ra>
